<compile_context>
chip_gen: v6e
topology: v6e:2x2x1
jax: 0.10.0
libtpu: 0.0.40
codegen_flags: <defaults>
</compile_context>

<pallas_src>
import functools
import math

import jax
import jax.numpy as jnp
import numpy as np
from jax.experimental import pallas as pl
from jax.experimental.pallas import tpu as pltpu


def _mhsa_kernel(x_ref, wqkv_ref, bqkv_ref, wot_ref, bo_ref, o_ref,
                 qkv_ref, ctx_ref, *, num_heads, bt, seq):
    E = wot_ref.shape[0]
    Dh = E // num_heads
    cdt = wqkv_ref.dtype          # matmul operand dtype (f32 or bf16)
    rows = bt * seq

    # Fused QKV in-projection over the whole (Bt*S, E) slab (fills MXU rows),
    # f32 accumulation, bias add, then ONE cast into the compute-dtype scratch.
    x2d = x_ref[...].reshape(rows, E).astype(cdt)
    qkv = jnp.dot(x2d, wqkv_ref[...], preferred_element_type=jnp.float32)
    qkv_ref[...] = (qkv + bqkv_ref[...]).astype(cdt)

    # Per-(batch, head) attention.  Batch loop is a bounded scf.for (no unroll
    # blow-up); head offsets are static so every slice/store is at a fixed
    # lane offset.
    def batch_body(b, carry):
        r0 = pl.multiple_of(b * seq, seq)
        qkv_b = qkv_ref[pl.ds(r0, seq), :]                    # (S, 3E), cdt
        for h in range(num_heads):
            c0 = h * Dh
            qh = qkv_b[:, c0:c0 + Dh]                         # scale pre-folded
            kh = qkv_b[:, E + c0:E + c0 + Dh]
            vh = qkv_b[:, 2 * E + c0:2 * E + c0 + Dh]

            # QK^T via contracting dims — no materialized K transpose.
            s = jax.lax.dot_general(
                qh, kh, dimension_numbers=(((1,), (1,)), ((), ())),
                preferred_element_type=jnp.float32)           # (S, S) f32

            m = jnp.max(s, axis=-1, keepdims=True)
            p = jnp.exp(s - m)                                # f32 EUP exps
            inv_l = pl.reciprocal(jnp.sum(p, axis=-1, keepdims=True),
                                  approx=True)                # (S, 1) f32

            # Deferred softmax normalization on the (S, Dh) head output.
            oh = jnp.dot(p.astype(cdt), vh,
                         preferred_element_type=jnp.float32) * inv_l
            ctx_ref[pl.ds(r0, seq), c0:c0 + Dh] = oh.astype(cdt)
        return carry

    jax.lax.fori_loop(0, bt, batch_body, 0)

    # ONE full-width output projection for the whole slab; bias broadcast once.
    out2d = jnp.dot(ctx_ref[...], wot_ref[...],
                    preferred_element_type=jnp.float32) + bo_ref[...]
    o_ref[...] = out2d.reshape(bt, seq, E).astype(o_ref.dtype)


def _tpu_generation_info():
    """(physical VMEM bytes, TensorCores per chip) with safe fallbacks."""
    vmem_bytes = 64 * 1024 * 1024          # v7x-sized (conservative) fallback
    num_cores = 1
    try:
        info = pltpu.get_tpu_info()
        vmem_bytes = int(getattr(info, "vmem_capacity_bytes", vmem_bytes))
    except Exception:
        pass
    try:
        kind = jax.devices()[0].device_kind.lower()
        if "v7" in kind:
            num_cores = 2                  # v7x: 2 TensorCores per chip
    except Exception:
        pass
    return vmem_bytes, num_cores


def _largest_divisor_leq(n, target):
    t = max(1, min(n, target))
    for d in range(t, 0, -1):
        if n % d == 0:
            return d
    return 1


def _pick_batch_tile(B, S, E, vmem_bytes, num_cores, cdt_itemsize):
    """Batch elements per grid step, sized against ~60% of *physical* VMEM
    (generation-aware).  The megacore B//num_cores split only applies on
    2-TensorCore chips (v7x); on v5e/v6e the grid is a serial loop, so the
    largest tile that fits wins."""
    per_b = ((S * 3 * E + S * E) * cdt_itemsize   # qkv + ctx scratch slabs
             + 2 * S * S * 4                      # live scores / probs (f32)
             + 2 * 2 * S * E * 4)                 # x + out blocks, dbl-buffered
    w_bytes = (3 * E * E + E * E) * cdt_itemsize + 4 * E * 4
    budget = max(int(0.6 * vmem_bytes) - 2 * w_bytes, per_b)
    bt = max(1, min(B, budget // max(per_b, 1)))
    if num_cores >= 2 and B >= 2:
        bt = min(bt, max(1, B // num_cores))      # keep >=2 steps for 2nd core
    return _largest_divisor_leq(B, bt)


def mhsa_pallas(x, in_proj_weight, in_proj_bias, out_proj_weight,
                out_proj_bias, num_heads, *, compute_dtype=jnp.float32):
    """x: (B, S, E) -> (B, S, E).  Matches torch.nn.MultiheadAttention forward
    (unmasked self-attention; the module's permutes make it batch-first).

    compute_dtype=jnp.bfloat16 is recommended on v5e, v6e and v7x: the MXU
    runs bf16 at full rate on all three and it halves weight/activation
    DMA + VMEM; accumulation, softmax statistics and the output stay f32.
    """
    B, S, E = x.shape
    assert E % num_heads == 0, "embed_dim must be divisible by num_heads"
    # (bt, S, E) <-> (bt*S, E) views inside the kernel are only free when S is
    # a multiple of the 8-row sublane tile.
    assert S % 8 == 0, "S must be a multiple of 8 (TODO(synk): pad + mask)"
    Dh = E // num_heads
    f32 = jnp.float32

    # One-time wrapper-side transposes/casts (loop-invariant).  Fold the
    # 1/sqrt(Dh) query scale into Wq and bq — zero kernel-side cost.
    col_scale = jnp.concatenate(
        [jnp.full((E,), 1.0 / math.sqrt(Dh), f32), jnp.ones((2 * E,), f32)])
    wqkv_t = (in_proj_weight.astype(f32).T * col_scale[None, :]
              ).astype(compute_dtype)                       # (E, 3E)
    bqkv = (in_proj_bias.astype(f32) * col_scale).reshape(1, 3 * E)   # f32
    wo_t = out_proj_weight.astype(f32).T.astype(compute_dtype)        # (E, E)
    bo = out_proj_bias.astype(f32).reshape(1, E)                      # f32

    vmem_bytes, num_cores = _tpu_generation_info()
    cdt_itemsize = jnp.dtype(compute_dtype).itemsize
    bt = _pick_batch_tile(B, S, E, vmem_bytes, num_cores, cdt_itemsize)
    grid = (B // bt,)

    # Explicit VMEM limit, clamped at ~75% of physical VMEM
    # (~96 MiB on v5e/v6e, ~48 MiB on v7x).
    per_step = ((bt * S * 3 * E + bt * S * E) * cdt_itemsize
                + 2 * S * S * 4
                + 2 * 2 * bt * S * E * x.dtype.itemsize
                + 2 * (3 * E * E + E * E) * cdt_itemsize
                + (1 << 20))
    vmem_limit = int(min(max(2 * per_step, 16 << 20), int(0.75 * vmem_bytes)))

    # Advisory cost estimate so XLA schedules neighbouring HLO sensibly.
    flops = int(2 * B * S * E * 3 * E          # QKV projection
                + 4 * B * S * S * E            # QK^T + PV across all heads
                + 2 * B * S * E * E)           # output projection
    transcendentals = int(B * num_heads * S * S)
    bytes_accessed = int(2 * B * S * E * x.dtype.itemsize
                         + 4 * E * E * cdt_itemsize + 4 * E * 4)
    cost = pl.CostEstimate(flops=flops, transcendentals=transcendentals,
                           bytes_accessed=bytes_accessed)

    kernel = functools.partial(_mhsa_kernel, num_heads=num_heads, bt=bt, seq=S)

    def build(single_buffer_weights):
        # Weights/biases are grid-invariant: single-buffer them so the saved
        # VMEM can go to a larger batch tile / deeper x-out buffering.
        wkw = ({"pipeline_mode": pl.Buffered(1)}
               if single_buffer_weights else {})
        grid_spec = pltpu.PrefetchScalarGridSpec(
            num_scalar_prefetch=0,
            grid=grid,
            in_specs=[
                pl.BlockSpec((bt, S, E), lambda i: (i, 0, 0)),        # x
                pl.BlockSpec((E, 3 * E), lambda i: (0, 0), **wkw),    # Wqkv^T
                pl.BlockSpec((1, 3 * E), lambda i: (0, 0), **wkw),    # bqkv
                pl.BlockSpec((E, E), lambda i: (0, 0), **wkw),        # Wo^T
                pl.BlockSpec((1, E), lambda i: (0, 0), **wkw),        # bo
            ],
            out_specs=pl.BlockSpec((bt, S, E), lambda i: (i, 0, 0)),
            scratch_shapes=[
                pltpu.VMEM((bt * S, 3 * E), compute_dtype),  # qkv slab
                pltpu.VMEM((bt * S, E), compute_dtype),      # head context slab
            ],
        )
        return pl.pallas_call(
            kernel,
            out_shape=jax.ShapeDtypeStruct((B, S, E), x.dtype),
            grid_spec=grid_spec,
            compiler_params=pltpu.CompilerParams(
                dimension_semantics=("parallel",),
                vmem_limit_bytes=vmem_limit),
            cost_estimate=cost,
        )

    try:
        return build(True)(x, wqkv_t, bqkv, wo_t, bo)
    except Exception:
        # Fallback for JAX builds that reject pipeline_mode=pl.Buffered(1):
        # default double-buffering (identical results, a bit more VMEM).
        return build(False)(x, wqkv_t, bqkv, wo_t, bo)


def mhsa_reference(x, in_proj_weight, in_proj_bias, out_proj_weight,
                   out_proj_bias, num_heads):
    """Pure-JAX reference matching torch.nn.MultiheadAttention forward."""
    B, S, E = x.shape
    Dh = E // num_heads
    wq, wk, wv = (in_proj_weight[0:E], in_proj_weight[E:2 * E],
                  in_proj_weight[2 * E:3 * E])
    bq, bk, bv = (in_proj_bias[0:E], in_proj_bias[E:2 * E],
                  in_proj_bias[2 * E:3 * E])
    q = x @ wq.T + bq
    k = x @ wk.T + bk
    v = x @ wv.T + bv
    q = q.reshape(B, S, num_heads, Dh).transpose(0, 2, 1, 3)
    k = k.reshape(B, S, num_heads, Dh).transpose(0, 2, 1, 3)
    v = v.reshape(B, S, num_heads, Dh).transpose(0, 2, 1, 3)
    s = jnp.einsum("bhqd,bhkd->bhqk", q, k) / math.sqrt(Dh)
    p = jax.nn.softmax(s, axis=-1)
    o = jnp.einsum("bhqk,bhkd->bhqd", p, v)
    o = o.transpose(0, 2, 1, 3).reshape(B, S, E)
    return o @ out_proj_weight.T + out_proj_bias


if __name__ == "__main__":
    B, S, E, H = 2, 8, 32, 4

    key = jax.random.PRNGKey(0)
    kx, kw, kb, kwo, kbo = jax.random.split(key, 5)

    x = jax.random.normal(kx, (B, S, E), dtype=jnp.float32)
    # Deterministic parameter init (shapes match nn.MultiheadAttention(E, H)).
    in_proj_weight = jax.random.normal(kw, (3 * E, E), dtype=jnp.float32) * 0.1
    in_proj_bias = jax.random.normal(kb, (3 * E,), dtype=jnp.float32) * 0.1
    out_proj_weight = jax.random.normal(kwo, (E, E), dtype=jnp.float32) * 0.1
    out_proj_bias = jax.random.normal(kbo, (E,), dtype=jnp.float32) * 0.1

    ref = mhsa_reference(x, in_proj_weight, in_proj_bias, out_proj_weight,
                         out_proj_bias, H)

    # f32 compute path.  Tolerance loosened slightly vs f32-exact: the softmax
    # denominator uses the EUP approximate reciprocal (~2^-12 relative error).
    out = jax.block_until_ready(
        mhsa_pallas(x, in_proj_weight, in_proj_bias, out_proj_weight,
                    out_proj_bias, H))
    np.testing.assert_allclose(np.asarray(out), np.asarray(ref),
                               rtol=2e-3, atol=2e-3)

    # bf16 compute path (recommended on v5e/v6e/v7x); accumulation stays f32.
    out_bf16 = jax.block_until_ready(
        mhsa_pallas(x, in_proj_weight, in_proj_bias, out_proj_weight,
                    out_proj_bias, H, compute_dtype=jnp.bfloat16))
    np.testing.assert_allclose(np.asarray(out_bf16), np.asarray(ref),
                               rtol=5e-2, atol=5e-2)

    print("KERNEL_OK")
</pallas_src>

<mosaic_0001>
module attributes {stable_mosaic.version = 11 : i64} {
  func.func @_mhsa_kernel(%arg0: i32, %arg1: memref<2x8x32xf32, #tpu.memory_space<vmem>>, %arg2: memref<32x96xf32, #tpu.memory_space<vmem>>, %arg3: memref<1x96xf32, #tpu.memory_space<vmem>>, %arg4: memref<32x32xf32, #tpu.memory_space<vmem>>, %arg5: memref<1x32xf32, #tpu.memory_space<vmem>>, %arg6: memref<2x8x32xf32, #tpu.memory_space<vmem>>, %arg7: memref<16x96xf32, #tpu.memory_space<vmem>>, %arg8: memref<16x32xf32, #tpu.memory_space<vmem>>) attributes {dimension_semantics = [#tpu.dimension_semantics<parallel>], iteration_bounds = array<i64: 1>, scalar_prefetch = 0 : i64, scratch_operands = 2 : i64, tpu.core_type = #tpu.core_type<tc>, window_params = [{transform_indices = @transform_0, window_bounds = array<i64: 2, 8, 32>}, {pipeline_mode = #tpu.pipeline_mode<synchronous>, transform_indices = @transform_1, window_bounds = array<i64: 32, 96>}, {pipeline_mode = #tpu.pipeline_mode<synchronous>, transform_indices = @transform_2, window_bounds = array<i64: 1, 96>}, {pipeline_mode = #tpu.pipeline_mode<synchronous>, transform_indices = @transform_3, window_bounds = array<i64: 32, 32>}, {pipeline_mode = #tpu.pipeline_mode<synchronous>, transform_indices = @transform_4, window_bounds = array<i64: 1, 32>}, {transform_indices = @transform_5, window_bounds = array<i64: 2, 8, 32>}]} {
    %c0 = arith.constant 0 : index
    %c0_0 = arith.constant 0 : index
    %c0_1 = arith.constant 0 : index
    %0 = vector.load %arg1[%c0, %c0_0, %c0_1] : memref<2x8x32xf32, #tpu.memory_space<vmem>>, vector<2x8x32xf32>
    %1 = vector.shape_cast %0 : vector<2x8x32xf32> to vector<16x32xf32>
    %c0_2 = arith.constant 0 : index
    %c0_3 = arith.constant 0 : index
    %2 = vector.load %arg2[%c0_2, %c0_3] : memref<32x96xf32, #tpu.memory_space<vmem>>, vector<32x96xf32>
    %cst = arith.constant dense<0.000000e+00> : vector<16x96xf32>
    %3 = tpu.matmul %1, %2, %cst {dimension_numbers = #tpu.dot_dimension_numbers<[1], [0], [0], [1], [0, 0, 1, 1], [], []>} : vector<16x32xf32>, vector<32x96xf32>, vector<16x96xf32> -> vector<16x96xf32>
    %c0_4 = arith.constant 0 : index
    %c0_5 = arith.constant 0 : index
    %4 = vector.load %arg3[%c0_4, %c0_5] : memref<1x96xf32, #tpu.memory_space<vmem>>, vector<1x96xf32>
    %5 = vector.broadcast %4 : vector<1x96xf32> to vector<16x96xf32>
    %6 = arith.addf %3, %5 : vector<16x96xf32>
    %c0_6 = arith.constant 0 : index
    %c0_7 = arith.constant 0 : index
    %7 = vector.load %arg7[%c0_6, %c0_7] : memref<16x96xf32, #tpu.memory_space<vmem>>, vector<16x96xf32>
    tpu.vector_store %arg7[%c0_6, %c0_7], %6 {strides = array<i32>} : memref<16x96xf32, #tpu.memory_space<vmem>>, vector<16x96xf32>,
    %c0_i32 = arith.constant 0 : i32
    %c2_i32 = arith.constant 2 : i32
    %8 = arith.addi %c0_i32, %c2_i32 : i32
    %c1_i32 = arith.constant 1 : i32
    scf.for %arg9 = %c0_i32 to %8 step %c1_i32  : i32 {
      %c8_i32 = arith.constant 8 : i32
      %17 = arith.muli %arg9, %c8_i32 : i32
      %18 = tpu.assume_multiple %17, 8 : i32
      %19 = arith.index_cast %18 : i32 to index
      %c0_19 = arith.constant 0 : index
      %20 = vector.load %arg7[%19, %c0_19] : memref<16x96xf32, #tpu.memory_space<vmem>>, vector<8x96xf32>
      %21 = vector.extract_strided_slice %20 {offsets = [0, 0], sizes = [8, 8], strides = [1, 1]} : vector<8x96xf32> to vector<8x8xf32>
      %22 = vector.extract_strided_slice %20 {offsets = [0, 32], sizes = [8, 8], strides = [1, 1]} : vector<8x96xf32> to vector<8x8xf32>
      %23 = vector.extract_strided_slice %20 {offsets = [0, 64], sizes = [8, 8], strides = [1, 1]} : vector<8x96xf32> to vector<8x8xf32>
      %cst_20 = arith.constant dense<0.000000e+00> : vector<8x8xf32>
      %24 = tpu.matmul %21, %22, %cst_20 {dimension_numbers = #tpu.dot_dimension_numbers<[1], [1], [0], [0], [0, 0, 1, 0], [], []>} : vector<8x8xf32>, vector<8x8xf32>, vector<8x8xf32> -> vector<8x8xf32>
      %cst_21 = arith.constant dense<0xFF800000> : vector<8xf32>
      %25 = vector.multi_reduction <maximumf>, %24, %cst_21 [1] : vector<8x8xf32> to vector<8xf32>
      %26 = vector.shape_cast %25 : vector<8xf32> to vector<8x1xf32>
      %27 = vector.broadcast %26 : vector<8x1xf32> to vector<8x8xf32>
      %28 = arith.subf %24, %27 : vector<8x8xf32>
      %29 = math.exp %28 : vector<8x8xf32>
      %cst_22 = arith.constant dense<0.000000e+00> : vector<8xf32>
      %30 = vector.multi_reduction <add>, %29, %cst_22 [1] : vector<8x8xf32> to vector<8xf32>
      %31 = vector.shape_cast %30 : vector<8xf32> to vector<8x1xf32>
      %32 = tpu.reciprocal %31 {approx = true} : vector<8x1xf32> -> vector<8x1xf32>
      %cst_23 = arith.constant dense<0.000000e+00> : vector<8x8xf32>
      %33 = tpu.matmul %29, %23, %cst_23 {dimension_numbers = #tpu.dot_dimension_numbers<[1], [0], [0], [1], [0, 0, 1, 1], [], []>} : vector<8x8xf32>, vector<8x8xf32>, vector<8x8xf32> -> vector<8x8xf32>
      %34 = vector.broadcast %32 : vector<8x1xf32> to vector<8x8xf32>
      %35 = arith.mulf %33, %34 : vector<8x8xf32>
      %36 = arith.index_cast %18 : i32 to index
      %c0_24 = arith.constant 0 : index
      %37 = vector.load %arg8[%36, %c0_24] : memref<16x32xf32, #tpu.memory_space<vmem>>, vector<8x8xf32>
      tpu.vector_store %arg8[%36, %c0_24], %35 {strides = array<i32>} : memref<16x32xf32, #tpu.memory_space<vmem>>, vector<8x8xf32>,
      %38 = vector.extract_strided_slice %20 {offsets = [0, 8], sizes = [8, 8], strides = [1, 1]} : vector<8x96xf32> to vector<8x8xf32>
      %39 = vector.extract_strided_slice %20 {offsets = [0, 40], sizes = [8, 8], strides = [1, 1]} : vector<8x96xf32> to vector<8x8xf32>
      %40 = vector.extract_strided_slice %20 {offsets = [0, 72], sizes = [8, 8], strides = [1, 1]} : vector<8x96xf32> to vector<8x8xf32>
      %cst_25 = arith.constant dense<0.000000e+00> : vector<8x8xf32>
      %41 = tpu.matmul %38, %39, %cst_25 {dimension_numbers = #tpu.dot_dimension_numbers<[1], [1], [0], [0], [0, 0, 1, 0], [], []>} : vector<8x8xf32>, vector<8x8xf32>, vector<8x8xf32> -> vector<8x8xf32>
      %cst_26 = arith.constant dense<0xFF800000> : vector<8xf32>
      %42 = vector.multi_reduction <maximumf>, %41, %cst_26 [1] : vector<8x8xf32> to vector<8xf32>
      %43 = vector.shape_cast %42 : vector<8xf32> to vector<8x1xf32>
      %44 = vector.broadcast %43 : vector<8x1xf32> to vector<8x8xf32>
      %45 = arith.subf %41, %44 : vector<8x8xf32>
      %46 = math.exp %45 : vector<8x8xf32>
      %cst_27 = arith.constant dense<0.000000e+00> : vector<8xf32>
      %47 = vector.multi_reduction <add>, %46, %cst_27 [1] : vector<8x8xf32> to vector<8xf32>
      %48 = vector.shape_cast %47 : vector<8xf32> to vector<8x1xf32>
      %49 = tpu.reciprocal %48 {approx = true} : vector<8x1xf32> -> vector<8x1xf32>
      %cst_28 = arith.constant dense<0.000000e+00> : vector<8x8xf32>
      %50 = tpu.matmul %46, %40, %cst_28 {dimension_numbers = #tpu.dot_dimension_numbers<[1], [0], [0], [1], [0, 0, 1, 1], [], []>} : vector<8x8xf32>, vector<8x8xf32>, vector<8x8xf32> -> vector<8x8xf32>
      %51 = vector.broadcast %49 : vector<8x1xf32> to vector<8x8xf32>
      %52 = arith.mulf %50, %51 : vector<8x8xf32>
      %53 = arith.index_cast %18 : i32 to index
      %c8 = arith.constant 8 : index
      %54 = vector.load %arg8[%53, %c8] : memref<16x32xf32, #tpu.memory_space<vmem>>, vector<8x8xf32>
      tpu.vector_store %arg8[%53, %c8], %52 {strides = array<i32>} : memref<16x32xf32, #tpu.memory_space<vmem>>, vector<8x8xf32>,
      %55 = vector.extract_strided_slice %20 {offsets = [0, 16], sizes = [8, 8], strides = [1, 1]} : vector<8x96xf32> to vector<8x8xf32>
      %56 = vector.extract_strided_slice %20 {offsets = [0, 48], sizes = [8, 8], strides = [1, 1]} : vector<8x96xf32> to vector<8x8xf32>
      %57 = vector.extract_strided_slice %20 {offsets = [0, 80], sizes = [8, 8], strides = [1, 1]} : vector<8x96xf32> to vector<8x8xf32>
      %cst_29 = arith.constant dense<0.000000e+00> : vector<8x8xf32>
      %58 = tpu.matmul %55, %56, %cst_29 {dimension_numbers = #tpu.dot_dimension_numbers<[1], [1], [0], [0], [0, 0, 1, 0], [], []>} : vector<8x8xf32>, vector<8x8xf32>, vector<8x8xf32> -> vector<8x8xf32>
      %cst_30 = arith.constant dense<0xFF800000> : vector<8xf32>
      %59 = vector.multi_reduction <maximumf>, %58, %cst_30 [1] : vector<8x8xf32> to vector<8xf32>
      %60 = vector.shape_cast %59 : vector<8xf32> to vector<8x1xf32>
      %61 = vector.broadcast %60 : vector<8x1xf32> to vector<8x8xf32>
      %62 = arith.subf %58, %61 : vector<8x8xf32>
      %63 = math.exp %62 : vector<8x8xf32>
      %cst_31 = arith.constant dense<0.000000e+00> : vector<8xf32>
      %64 = vector.multi_reduction <add>, %63, %cst_31 [1] : vector<8x8xf32> to vector<8xf32>
      %65 = vector.shape_cast %64 : vector<8xf32> to vector<8x1xf32>
      %66 = tpu.reciprocal %65 {approx = true} : vector<8x1xf32> -> vector<8x1xf32>
      %cst_32 = arith.constant dense<0.000000e+00> : vector<8x8xf32>
      %67 = tpu.matmul %63, %57, %cst_32 {dimension_numbers = #tpu.dot_dimension_numbers<[1], [0], [0], [1], [0, 0, 1, 1], [], []>} : vector<8x8xf32>, vector<8x8xf32>, vector<8x8xf32> -> vector<8x8xf32>
      %68 = vector.broadcast %66 : vector<8x1xf32> to vector<8x8xf32>
      %69 = arith.mulf %67, %68 : vector<8x8xf32>
      %70 = arith.index_cast %18 : i32 to index
      %c16 = arith.constant 16 : index
      %71 = vector.load %arg8[%70, %c16] : memref<16x32xf32, #tpu.memory_space<vmem>>, vector<8x8xf32>
      tpu.vector_store %arg8[%70, %c16], %69 {strides = array<i32>} : memref<16x32xf32, #tpu.memory_space<vmem>>, vector<8x8xf32>,
      %72 = vector.extract_strided_slice %20 {offsets = [0, 24], sizes = [8, 8], strides = [1, 1]} : vector<8x96xf32> to vector<8x8xf32>
      %73 = vector.extract_strided_slice %20 {offsets = [0, 56], sizes = [8, 8], strides = [1, 1]} : vector<8x96xf32> to vector<8x8xf32>
      %74 = vector.extract_strided_slice %20 {offsets = [0, 88], sizes = [8, 8], strides = [1, 1]} : vector<8x96xf32> to vector<8x8xf32>
      %cst_33 = arith.constant dense<0.000000e+00> : vector<8x8xf32>
      %75 = tpu.matmul %72, %73, %cst_33 {dimension_numbers = #tpu.dot_dimension_numbers<[1], [1], [0], [0], [0, 0, 1, 0], [], []>} : vector<8x8xf32>, vector<8x8xf32>, vector<8x8xf32> -> vector<8x8xf32>
      %cst_34 = arith.constant dense<0xFF800000> : vector<8xf32>
      %76 = vector.multi_reduction <maximumf>, %75, %cst_34 [1] : vector<8x8xf32> to vector<8xf32>
      %77 = vector.shape_cast %76 : vector<8xf32> to vector<8x1xf32>
      %78 = vector.broadcast %77 : vector<8x1xf32> to vector<8x8xf32>
      %79 = arith.subf %75, %78 : vector<8x8xf32>
      %80 = math.exp %79 : vector<8x8xf32>
      %cst_35 = arith.constant dense<0.000000e+00> : vector<8xf32>
      %81 = vector.multi_reduction <add>, %80, %cst_35 [1] : vector<8x8xf32> to vector<8xf32>
      %82 = vector.shape_cast %81 : vector<8xf32> to vector<8x1xf32>
      %83 = tpu.reciprocal %82 {approx = true} : vector<8x1xf32> -> vector<8x1xf32>
      %cst_36 = arith.constant dense<0.000000e+00> : vector<8x8xf32>
      %84 = tpu.matmul %80, %74, %cst_36 {dimension_numbers = #tpu.dot_dimension_numbers<[1], [0], [0], [1], [0, 0, 1, 1], [], []>} : vector<8x8xf32>, vector<8x8xf32>, vector<8x8xf32> -> vector<8x8xf32>
      %85 = vector.broadcast %83 : vector<8x1xf32> to vector<8x8xf32>
      %86 = arith.mulf %84, %85 : vector<8x8xf32>
      %87 = arith.index_cast %18 : i32 to index
      %c24 = arith.constant 24 : index
      %88 = vector.load %arg8[%87, %c24] : memref<16x32xf32, #tpu.memory_space<vmem>>, vector<8x8xf32>
      tpu.vector_store %arg8[%87, %c24], %86 {strides = array<i32>} : memref<16x32xf32, #tpu.memory_space<vmem>>, vector<8x8xf32>,
    }
    %c2_i32_8 = arith.constant 2 : i32
    %c0_9 = arith.constant 0 : index
    %c0_10 = arith.constant 0 : index
    %9 = vector.load %arg8[%c0_9, %c0_10] : memref<16x32xf32, #tpu.memory_space<vmem>>, vector<16x32xf32>
    %c0_11 = arith.constant 0 : index
    %c0_12 = arith.constant 0 : index
    %10 = vector.load %arg4[%c0_11, %c0_12] : memref<32x32xf32, #tpu.memory_space<vmem>>, vector<32x32xf32>
    %cst_13 = arith.constant dense<0.000000e+00> : vector<16x32xf32>
    %11 = tpu.matmul %9, %10, %cst_13 {dimension_numbers = #tpu.dot_dimension_numbers<[1], [0], [0], [1], [0, 0, 1, 1], [], []>} : vector<16x32xf32>, vector<32x32xf32>, vector<16x32xf32> -> vector<16x32xf32>
    %c0_14 = arith.constant 0 : index
    %c0_15 = arith.constant 0 : index
    %12 = vector.load %arg5[%c0_14, %c0_15] : memref<1x32xf32, #tpu.memory_space<vmem>>, vector<1x32xf32>
    %13 = vector.broadcast %12 : vector<1x32xf32> to vector<16x32xf32>
    %14 = arith.addf %11, %13 : vector<16x32xf32>
    %15 = vector.shape_cast %14 : vector<16x32xf32> to vector<2x8x32xf32>
    %c0_16 = arith.constant 0 : index
    %c0_17 = arith.constant 0 : index
    %c0_18 = arith.constant 0 : index
    %16 = vector.load %arg6[%c0_16, %c0_17, %c0_18] : memref<2x8x32xf32, #tpu.memory_space<vmem>>, vector<2x8x32xf32>
    tpu.vector_store %arg6[%c0_16, %c0_17, %c0_18], %15 {strides = array<i32>} : memref<2x8x32xf32, #tpu.memory_space<vmem>>, vector<2x8x32xf32>,
    return
  }
  func.func @transform_0(%arg0: i32) -> (i32, i32, i32) {
    %c0_i32 = arith.constant 0 : i32
    %c0_i32_0 = arith.constant 0 : i32
    %c0_i32_1 = arith.constant 0 : i32
    return %arg0, %c0_i32, %c0_i32_0 : i32, i32, i32
  }
  func.func @transform_1(%arg0: i32) -> (i32, i32) {
    %c0_i32 = arith.constant 0 : i32
    %c0_i32_0 = arith.constant 0 : i32
    %c0_i32_1 = arith.constant 0 : i32
    return %c0_i32, %c0_i32_0 : i32, i32
  }
  func.func @transform_2(%arg0: i32) -> (i32, i32) {
    %c0_i32 = arith.constant 0 : i32
    %c0_i32_0 = arith.constant 0 : i32
    %c0_i32_1 = arith.constant 0 : i32
    return %c0_i32, %c0_i32_0 : i32, i32
  }
  func.func @transform_3(%arg0: i32) -> (i32, i32) {
    %c0_i32 = arith.constant 0 : i32
    %c0_i32_0 = arith.constant 0 : i32
    %c0_i32_1 = arith.constant 0 : i32
    return %c0_i32, %c0_i32_0 : i32, i32
  }
  func.func @transform_4(%arg0: i32) -> (i32, i32) {
    %c0_i32 = arith.constant 0 : i32
    %c0_i32_0 = arith.constant 0 : i32
    %c0_i32_1 = arith.constant 0 : i32
    return %c0_i32, %c0_i32_0 : i32, i32
  }
  func.func @transform_5(%arg0: i32) -> (i32, i32, i32) {
    %c0_i32 = arith.constant 0 : i32
    %c0_i32_0 = arith.constant 0 : i32
    %c0_i32_1 = arith.constant 0 : i32
    return %arg0, %c0_i32, %c0_i32_0 : i32, i32, i32
  }
}

module attributes {stable_mosaic.version = 11 : i64} {
  func.func @_mhsa_kernel(%arg0: i32, %arg1: memref<2x8x32xf32, #tpu.memory_space<vmem>>, %arg2: memref<32x96xf32, #tpu.memory_space<vmem>>, %arg3: memref<1x96xf32, #tpu.memory_space<vmem>>, %arg4: memref<32x32xf32, #tpu.memory_space<vmem>>, %arg5: memref<1x32xf32, #tpu.memory_space<vmem>>, %arg6: memref<2x8x32xf32, #tpu.memory_space<vmem>>, %arg7: memref<16x96xf32, #tpu.memory_space<vmem>>, %arg8: memref<16x32xf32, #tpu.memory_space<vmem>>) attributes {dimension_semantics = [#tpu.dimension_semantics<parallel>], iteration_bounds = array<i64: 1>, scalar_prefetch = 0 : i64, scratch_operands = 2 : i64, tpu.core_type = #tpu.core_type<tc>, window_params = [{transform_indices = @transform_0, window_bounds = array<i64: 2, 8, 32>}, {pipeline_mode = #tpu.pipeline_mode<synchronous>, transform_indices = @transform_1, window_bounds = array<i64: 32, 96>}, {pipeline_mode = #tpu.pipeline_mode<synchronous>, transform_indices = @transform_2, window_bounds = array<i64: 1, 96>}, {pipeline_mode = #tpu.pipeline_mode<synchronous>, transform_indices = @transform_3, window_bounds = array<i64: 32, 32>}, {pipeline_mode = #tpu.pipeline_mode<synchronous>, transform_indices = @transform_4, window_bounds = array<i64: 1, 32>}, {transform_indices = @transform_5, window_bounds = array<i64: 2, 8, 32>}]} {
    %c0 = arith.constant 0 : index
    %c0_0 = arith.constant 0 : index
    %c0_1 = arith.constant 0 : index
    %0 = vector.load %arg1[%c0, %c0_0, %c0_1] : memref<2x8x32xf32, #tpu.memory_space<vmem>>, vector<2x8x32xf32>
    %1 = vector.shape_cast %0 : vector<2x8x32xf32> to vector<16x32xf32>
    %c0_2 = arith.constant 0 : index
    %c0_3 = arith.constant 0 : index
    %2 = vector.load %arg2[%c0_2, %c0_3] : memref<32x96xf32, #tpu.memory_space<vmem>>, vector<32x96xf32>
    %cst = arith.constant dense<0.000000e+00> : vector<16x96xf32>
    %3 = tpu.matmul %1, %2, %cst {dimension_numbers = #tpu.dot_dimension_numbers<[1], [0], [0], [1], [0, 0, 1, 1], [], []>} : vector<16x32xf32>, vector<32x96xf32>, vector<16x96xf32> -> vector<16x96xf32>
    %c0_4 = arith.constant 0 : index
    %c0_5 = arith.constant 0 : index
    %4 = vector.load %arg3[%c0_4, %c0_5] : memref<1x96xf32, #tpu.memory_space<vmem>>, vector<1x96xf32>
    %5 = vector.broadcast %4 : vector<1x96xf32> to vector<16x96xf32>
    %6 = arith.addf %3, %5 : vector<16x96xf32>
    %c0_6 = arith.constant 0 : index
    %c0_7 = arith.constant 0 : index
    %7 = vector.load %arg7[%c0_6, %c0_7] : memref<16x96xf32, #tpu.memory_space<vmem>>, vector<16x96xf32>
    tpu.vector_store %arg7[%c0_6, %c0_7], %6 {strides = array<i32>} : memref<16x96xf32, #tpu.memory_space<vmem>>, vector<16x96xf32>,
    %c0_i32 = arith.constant 0 : i32
    %c2_i32 = arith.constant 2 : i32
    %8 = arith.addi %c0_i32, %c2_i32 : i32
    %c1_i32 = arith.constant 1 : i32
    scf.for %arg9 = %c0_i32 to %8 step %c1_i32  : i32 {
      %c8_i32 = arith.constant 8 : i32
      %17 = arith.muli %arg9, %c8_i32 : i32
      %18 = tpu.assume_multiple %17, 8 : i32
      %19 = arith.index_cast %18 : i32 to index
      %c0_19 = arith.constant 0 : index
      %20 = vector.load %arg7[%19, %c0_19] : memref<16x96xf32, #tpu.memory_space<vmem>>, vector<8x96xf32>
      %21 = vector.extract_strided_slice %20 {offsets = [0, 0], sizes = [8, 8], strides = [1, 1]} : vector<8x96xf32> to vector<8x8xf32>
      %22 = vector.extract_strided_slice %20 {offsets = [0, 32], sizes = [8, 8], strides = [1, 1]} : vector<8x96xf32> to vector<8x8xf32>
      %23 = vector.extract_strided_slice %20 {offsets = [0, 64], sizes = [8, 8], strides = [1, 1]} : vector<8x96xf32> to vector<8x8xf32>
      %cst_20 = arith.constant dense<0.000000e+00> : vector<8x8xf32>
      %24 = tpu.matmul %21, %22, %cst_20 {dimension_numbers = #tpu.dot_dimension_numbers<[1], [1], [0], [0], [0, 0, 1, 0], [], []>} : vector<8x8xf32>, vector<8x8xf32>, vector<8x8xf32> -> vector<8x8xf32>
      %cst_21 = arith.constant dense<0xFF800000> : vector<8xf32>
      %25 = vector.multi_reduction <maximumf>, %24, %cst_21 [1] : vector<8x8xf32> to vector<8xf32>
      %26 = vector.shape_cast %25 : vector<8xf32> to vector<8x1xf32>
      %27 = vector.broadcast %26 : vector<8x1xf32> to vector<8x8xf32>
      %28 = arith.subf %24, %27 : vector<8x8xf32>
      %29 = math.exp %28 : vector<8x8xf32>
      %cst_22 = arith.constant dense<0.000000e+00> : vector<8xf32>
      %30 = vector.multi_reduction <add>, %29, %cst_22 [1] : vector<8x8xf32> to vector<8xf32>
      %31 = vector.shape_cast %30 : vector<8xf32> to vector<8x1xf32>
      %32 = tpu.reciprocal %31 {approx = true} : vector<8x1xf32> -> vector<8x1xf32>
      %cst_23 = arith.constant dense<0.000000e+00> : vector<8x8xf32>
      %33 = tpu.matmul %29, %23, %cst_23 {dimension_numbers = #tpu.dot_dimension_numbers<[1], [0], [0], [1], [0, 0, 1, 1], [], []>} : vector<8x8xf32>, vector<8x8xf32>, vector<8x8xf32> -> vector<8x8xf32>
      %34 = vector.broadcast %32 : vector<8x1xf32> to vector<8x8xf32>
      %35 = arith.mulf %33, %34 : vector<8x8xf32>
      %36 = arith.index_cast %18 : i32 to index
      %c0_24 = arith.constant 0 : index
      %37 = vector.load %arg8[%36, %c0_24] : memref<16x32xf32, #tpu.memory_space<vmem>>, vector<8x8xf32>
      tpu.vector_store %arg8[%36, %c0_24], %35 {strides = array<i32>} : memref<16x32xf32, #tpu.memory_space<vmem>>, vector<8x8xf32>,
      %38 = vector.extract_strided_slice %20 {offsets = [0, 8], sizes = [8, 8], strides = [1, 1]} : vector<8x96xf32> to vector<8x8xf32>
      %39 = vector.extract_strided_slice %20 {offsets = [0, 40], sizes = [8, 8], strides = [1, 1]} : vector<8x96xf32> to vector<8x8xf32>
      %40 = vector.extract_strided_slice %20 {offsets = [0, 72], sizes = [8, 8], strides = [1, 1]} : vector<8x96xf32> to vector<8x8xf32>
      %cst_25 = arith.constant dense<0.000000e+00> : vector<8x8xf32>
      %41 = tpu.matmul %38, %39, %cst_25 {dimension_numbers = #tpu.dot_dimension_numbers<[1], [1], [0], [0], [0, 0, 1, 0], [], []>} : vector<8x8xf32>, vector<8x8xf32>, vector<8x8xf32> -> vector<8x8xf32>
      %cst_26 = arith.constant dense<0xFF800000> : vector<8xf32>
      %42 = vector.multi_reduction <maximumf>, %41, %cst_26 [1] : vector<8x8xf32> to vector<8xf32>
      %43 = vector.shape_cast %42 : vector<8xf32> to vector<8x1xf32>
      %44 = vector.broadcast %43 : vector<8x1xf32> to vector<8x8xf32>
      %45 = arith.subf %41, %44 : vector<8x8xf32>
      %46 = math.exp %45 : vector<8x8xf32>
      %cst_27 = arith.constant dense<0.000000e+00> : vector<8xf32>
      %47 = vector.multi_reduction <add>, %46, %cst_27 [1] : vector<8x8xf32> to vector<8xf32>
      %48 = vector.shape_cast %47 : vector<8xf32> to vector<8x1xf32>
      %49 = tpu.reciprocal %48 {approx = true} : vector<8x1xf32> -> vector<8x1xf32>
      %cst_28 = arith.constant dense<0.000000e+00> : vector<8x8xf32>
      %50 = tpu.matmul %46, %40, %cst_28 {dimension_numbers = #tpu.dot_dimension_numbers<[1], [0], [0], [1], [0, 0, 1, 1], [], []>} : vector<8x8xf32>, vector<8x8xf32>, vector<8x8xf32> -> vector<8x8xf32>
      %51 = vector.broadcast %49 : vector<8x1xf32> to vector<8x8xf32>
      %52 = arith.mulf %50, %51 : vector<8x8xf32>
      %53 = arith.index_cast %18 : i32 to index
      %c8 = arith.constant 8 : index
      %54 = vector.load %arg8[%53, %c8] : memref<16x32xf32, #tpu.memory_space<vmem>>, vector<8x8xf32>
      tpu.vector_store %arg8[%53, %c8], %52 {strides = array<i32>} : memref<16x32xf32, #tpu.memory_space<vmem>>, vector<8x8xf32>,
      %55 = vector.extract_strided_slice %20 {offsets = [0, 16], sizes = [8, 8], strides = [1, 1]} : vector<8x96xf32> to vector<8x8xf32>
      %56 = vector.extract_strided_slice %20 {offsets = [0, 48], sizes = [8, 8], strides = [1, 1]} : vector<8x96xf32> to vector<8x8xf32>
      %57 = vector.extract_strided_slice %20 {offsets = [0, 80], sizes = [8, 8], strides = [1, 1]} : vector<8x96xf32> to vector<8x8xf32>
      %cst_29 = arith.constant dense<0.000000e+00> : vector<8x8xf32>
      %58 = tpu.matmul %55, %56, %cst_29 {dimension_numbers = #tpu.dot_dimension_numbers<[1], [1], [0], [0], [0, 0, 1, 0], [], []>} : vector<8x8xf32>, vector<8x8xf32>, vector<8x8xf32> -> vector<8x8xf32>
      %cst_30 = arith.constant dense<0xFF800000> : vector<8xf32>
      %59 = vector.multi_reduction <maximumf>, %58, %cst_30 [1] : vector<8x8xf32> to vector<8xf32>
      %60 = vector.shape_cast %59 : vector<8xf32> to vector<8x1xf32>
      %61 = vector.broadcast %60 : vector<8x1xf32> to vector<8x8xf32>
      %62 = arith.subf %58, %61 : vector<8x8xf32>
      %63 = math.exp %62 : vector<8x8xf32>
      %cst_31 = arith.constant dense<0.000000e+00> : vector<8xf32>
      %64 = vector.multi_reduction <add>, %63, %cst_31 [1] : vector<8x8xf32> to vector<8xf32>
      %65 = vector.shape_cast %64 : vector<8xf32> to vector<8x1xf32>
      %66 = tpu.reciprocal %65 {approx = true} : vector<8x1xf32> -> vector<8x1xf32>
      %cst_32 = arith.constant dense<0.000000e+00> : vector<8x8xf32>
      %67 = tpu.matmul %63, %57, %cst_32 {dimension_numbers = #tpu.dot_dimension_numbers<[1], [0], [0], [1], [0, 0, 1, 1], [], []>} : vector<8x8xf32>, vector<8x8xf32>, vector<8x8xf32> -> vector<8x8xf32>
      %68 = vector.broadcast %66 : vector<8x1xf32> to vector<8x8xf32>
      %69 = arith.mulf %67, %68 : vector<8x8xf32>
      %70 = arith.index_cast %18 : i32 to index
      %c16 = arith.constant 16 : index
      %71 = vector.load %arg8[%70, %c16] : memref<16x32xf32, #tpu.memory_space<vmem>>, vector<8x8xf32>
      tpu.vector_store %arg8[%70, %c16], %69 {strides = array<i32>} : memref<16x32xf32, #tpu.memory_space<vmem>>, vector<8x8xf32>,
      %72 = vector.extract_strided_slice %20 {offsets = [0, 24], sizes = [8, 8], strides = [1, 1]} : vector<8x96xf32> to vector<8x8xf32>
      %73 = vector.extract_strided_slice %20 {offsets = [0, 56], sizes = [8, 8], strides = [1, 1]} : vector<8x96xf32> to vector<8x8xf32>
      %74 = vector.extract_strided_slice %20 {offsets = [0, 88], sizes = [8, 8], strides = [1, 1]} : vector<8x96xf32> to vector<8x8xf32>
      %cst_33 = arith.constant dense<0.000000e+00> : vector<8x8xf32>
      %75 = tpu.matmul %72, %73, %cst_33 {dimension_numbers = #tpu.dot_dimension_numbers<[1], [1], [0], [0], [0, 0, 1, 0], [], []>} : vector<8x8xf32>, vector<8x8xf32>, vector<8x8xf32> -> vector<8x8xf32>
      %cst_34 = arith.constant dense<0xFF800000> : vector<8xf32>
      %76 = vector.multi_reduction <maximumf>, %75, %cst_34 [1] : vector<8x8xf32> to vector<8xf32>
      %77 = vector.shape_cast %76 : vector<8xf32> to vector<8x1xf32>
      %78 = vector.broadcast %77 : vector<8x1xf32> to vector<8x8xf32>
      %79 = arith.subf %75, %78 : vector<8x8xf32>
      %80 = math.exp %79 : vector<8x8xf32>
      %cst_35 = arith.constant dense<0.000000e+00> : vector<8xf32>
      %81 = vector.multi_reduction <add>, %80, %cst_35 [1] : vector<8x8xf32> to vector<8xf32>
      %82 = vector.shape_cast %81 : vector<8xf32> to vector<8x1xf32>
      %83 = tpu.reciprocal %82 {approx = true} : vector<8x1xf32> -> vector<8x1xf32>
      %cst_36 = arith.constant dense<0.000000e+00> : vector<8x8xf32>
      %84 = tpu.matmul %80, %74, %cst_36 {dimension_numbers = #tpu.dot_dimension_numbers<[1], [0], [0], [1], [0, 0, 1, 1], [], []>} : vector<8x8xf32>, vector<8x8xf32>, vector<8x8xf32> -> vector<8x8xf32>
      %85 = vector.broadcast %83 : vector<8x1xf32> to vector<8x8xf32>
      %86 = arith.mulf %84, %85 : vector<8x8xf32>
      %87 = arith.index_cast %18 : i32 to index
      %c24 = arith.constant 24 : index
      %88 = vector.load %arg8[%87, %c24] : memref<16x32xf32, #tpu.memory_space<vmem>>, vector<8x8xf32>
      tpu.vector_store %arg8[%87, %c24], %86 {strides = array<i32>} : memref<16x32xf32, #tpu.memory_space<vmem>>, vector<8x8xf32>,
    }
    %c2_i32_8 = arith.constant 2 : i32
    %c0_9 = arith.constant 0 : index
    %c0_10 = arith.constant 0 : index
    %9 = vector.load %arg8[%c0_9, %c0_10] : memref<16x32xf32, #tpu.memory_space<vmem>>, vector<16x32xf32>
    %c0_11 = arith.constant 0 : index
    %c0_12 = arith.constant 0 : index
    %10 = vector.load %arg4[%c0_11, %c0_12] : memref<32x32xf32, #tpu.memory_space<vmem>>, vector<32x32xf32>
    %cst_13 = arith.constant dense<0.000000e+00> : vector<16x32xf32>
    %11 = tpu.matmul %9, %10, %cst_13 {dimension_numbers = #tpu.dot_dimension_numbers<[1], [0], [0], [1], [0, 0, 1, 1], [], []>} : vector<16x32xf32>, vector<32x32xf32>, vector<16x32xf32> -> vector<16x32xf32>
    %c0_14 = arith.constant 0 : index
    %c0_15 = arith.constant 0 : index
    %12 = vector.load %arg5[%c0_14, %c0_15] : memref<1x32xf32, #tpu.memory_space<vmem>>, vector<1x32xf32>
    %13 = vector.broadcast %12 : vector<1x32xf32> to vector<16x32xf32>
    %14 = arith.addf %11, %13 : vector<16x32xf32>
    %15 = vector.shape_cast %14 : vector<16x32xf32> to vector<2x8x32xf32>
    %c0_16 = arith.constant 0 : index
    %c0_17 = arith.constant 0 : index
    %c0_18 = arith.constant 0 : index
    %16 = vector.load %arg6[%c0_16, %c0_17, %c0_18] : memref<2x8x32xf32, #tpu.memory_space<vmem>>, vector<2x8x32xf32>
    tpu.vector_store %arg6[%c0_16, %c0_17, %c0_18], %15 {strides = array<i32>} : memref<2x8x32xf32, #tpu.memory_space<vmem>>, vector<2x8x32xf32>,
    return
  }
  func.func @transform_0(%arg0: i32) -> (i32, i32, i32) {
    %c0_i32 = arith.constant 0 : i32
    %c0_i32_0 = arith.constant 0 : i32
    %c0_i32_1 = arith.constant 0 : i32
    return %arg0, %c0_i32, %c0_i32_0 : i32, i32, i32
  }
  func.func @transform_1(%arg0: i32) -> (i32, i32) {
    %c0_i32 = arith.constant 0 : i32
    %c0_i32_0 = arith.constant 0 : i32
    %c0_i32_1 = arith.constant 0 : i32
    return %c0_i32, %c0_i32_0 : i32, i32
  }
  func.func @transform_2(%arg0: i32) -> (i32, i32) {
    %c0_i32 = arith.constant 0 : i32
    %c0_i32_0 = arith.constant 0 : i32
    %c0_i32_1 = arith.constant 0 : i32
    return %c0_i32, %c0_i32_0 : i32, i32
  }
  func.func @transform_3(%arg0: i32) -> (i32, i32) {
    %c0_i32 = arith.constant 0 : i32
    %c0_i32_0 = arith.constant 0 : i32
    %c0_i32_1 = arith.constant 0 : i32
    return %c0_i32, %c0_i32_0 : i32, i32
  }
  func.func @transform_4(%arg0: i32) -> (i32, i32) {
    %c0_i32 = arith.constant 0 : i32
    %c0_i32_0 = arith.constant 0 : i32
    %c0_i32_1 = arith.constant 0 : i32
    return %c0_i32, %c0_i32_0 : i32, i32
  }
  func.func @transform_5(%arg0: i32) -> (i32, i32, i32) {
    %c0_i32 = arith.constant 0 : i32
    %c0_i32_0 = arith.constant 0 : i32
    %c0_i32_1 = arith.constant 0 : i32
    return %arg0, %c0_i32, %c0_i32_0 : i32, i32, i32
  }
}

</mosaic_0001>

<bundles_post_ra>
// kernel: tpu_custom_call.1
= control target key start
LH: loop header
LB: loop body
LE: loop exit
PB: predicated region body
PF: predicated region fallthrough
CT: control target
= control target key end

     0   :  { %10 = vsyncpa [#allocation5], 0  ;;  %s1391_s0 = inlined_call_operand.hbm [shape: f32[2,8,32], index: 0, kind: input, shape index: {}]   ;;  %s1392_s1 = inlined_call_operand.hbm [shape: f32[32,96], index: 1, kind: input, shape index: {}]   ;;  %s1393_s2 = inlined_call_operand.vmem [shape: f32[1,96], index: 2, kind: input, shape index: {}]   ;;  %s1394_s3 = inlined_call_operand.hbm [shape: f32[32,32], index: 3, kind: input, shape index: {}]   ;;  %s1395_s4 = inlined_call_operand.vmem [shape: f32[1,32], index: 4, kind: input, shape index: {}]   ;;  %s1396_s5 = inlined_call_operand.hbm [shape: f32[2,8,32], index: 5, kind: output, shape index: {}]  }
   0x1   :  { %11 = vsyncpa [#allocation8], 0 }
   0x2   :  { %12 = vsyncpa [#allocation6], 0  ;;  %s1221_s18 = smov [#allocation7]   ;;  %s1222_s20 = smov [#allocation4]  }
   0x3   :  { %s30_s19 = sshll.u32 %s1221_s18, 4  ;;  %s18_s21 = sshll.u32 %s1222_s20, 4  ;;  %s31_s19 = int_to_ptr.vmem [resolvable:$true] %s30_s19  ;;  %s19_s21 = int_to_ptr.vmem [resolvable:$true] %s18_s21 }
   0x4   :  { %s1135_s22 = scalar_lea.vmem %s31_s19, 512  ;;  %p1140_p1 = scmp.lt.s32.totalorder %s31_s19, %s31_s19 }
   0x5   :  { %p1136_p0 = scmp.ne.s32.totalorder %s31_s19, %s1135_s22  ;;  %p1141_p2 = scmp.lt.s32.totalorder %s1135_s22, %s1135_s22 }
   0x7   :  { %p1142_p3 = por %p1141_p2, %p1140_p1 }
   0x9   :  { %p1143_p4 = pnand %p1142_p3, %p1136_p0 }
   0xb   :  { %1146 = shalt.err (!%p1143_p4)
}
   0xc   :  { %s1223_s23 = smov 128   ;;  %s1224_s24 = smov 8  }
   0xd   :  { %36 = dma.hbm_to_vmem [thread:$0]  %s1392_s1, 512, %s31_s19, [#allocation8], %s1223_s23, %s1223_s23, %s1224_s24  }
   0xe   :  { %s1155_s27 = scalar_lea.vmem %s19_s21, 256  ;;  %p1160_p6 = scmp.lt.s32.totalorder %s19_s21, %s19_s21 }
   0xf   :  { %p1156_p5 = scmp.ne.s32.totalorder %s19_s21, %s1155_s27  ;;  %p1161_p7 = scmp.lt.s32.totalorder %s1155_s27, %s1155_s27 }
  0x11   :  { %p1162_p8 = por %p1161_p7, %p1160_p6 }
  0x13   :  { %p1163_p9 = pnand %p1162_p8, %p1156_p5 }
  0x15   :  { %1166 = shalt.err (!%p1163_p9)
}
  0x16   :  { %24 = dma.hbm_to_vmem [thread:$0]  %s1391_s0, 256, %s19_s21, [#allocation5], %s1223_s23, %s1223_s23, %s1224_s24  }
  0x17   :  { %s1225_s30 = smov [#allocation9]  }
  0x18   :  { %s44_s6 = sshll.u32 %s1225_s30, 4  ;;  %s45_s6 = int_to_ptr.vmem [resolvable:$true] %s44_s6 }
  0x19   :  { %s1175_s7 = scalar_lea.vmem %s45_s6, 512  ;;  %p1180_p11 = scmp.lt.s32.totalorder %s45_s6, %s45_s6 }
  0x1a   :  { %p1176_p10 = scmp.ne.s32.totalorder %s45_s6, %s1175_s7  ;;  %p1181_p12 = scmp.lt.s32.totalorder %s1175_s7, %s1175_s7 }
  0x1c   :  { %p1182_p13 = por %p1181_p12, %p1180_p11 }
  0x1e   :  { %p1183_p0 = pnand %p1182_p13, %p1176_p10 }
  0x20   :  { %1186 = shalt.err (!%p1183_p0)
}
  0x21   :  { %50 = dma.hbm_to_vmem [thread:$0]  %s1394_s3, 512, %s45_s6, [#allocation8], %s1223_s23, %s1223_s23, %s1224_s24  }
  0x22   :  { %1211 = dma.done.wait [#allocation5], 256  }
  0x23   :  { %1212 = vsyncadd [#allocation5], 4294967040 }
  0x24   :  { %1213 = dma.done.wait [#allocation8], 1024  }
  0x25   :  { %1214 = vsyncadd [#allocation8], 4294966272  ;;  %vm75_vm0 = vcmask 261120   ;;  %v67_v0 = vld [vmem:[#allocation7 + $0x18] sm:$0xff]  ;;  %v66_v1 = vld [vmem:[#allocation7 + $0x10] sm:$0xff]  ;;  %vm157_vm1 = vcmask 785408  }
  0x26   :  { %1019 = vmatprep.subr.mxu0 %v67_v0  ;;  %v62_v2 = vld [vmem:[#allocation4] sm:$0xff]  ;;  %v65_v3 = vld [vmem:[#allocation7 + $0x8] sm:$0xff]  ;;  %v64_v4 = vld [vmem:[#allocation7] sm:$0xff]  ;;  %s1296_s9 = smov 0  }
  0x27   :  { %1020 = vmatpush3.msra.mxu0 %v67_v0  ;;  %1027 = vmatprep.mubr.msk.f32.mxu0 %vm75_vm0, %v62_v2  ;;  %v63_v5 = vld [vmem:[#allocation4 + $0x8] sm:$0xff]  ;;  %v972_v6 = vld [vmem:[%s1393_s2] ss:$0 sm:$0xff] }
  0x28   :  { %1021 = vmatprep.subr.mxu0 %v66_v1 }
  0x29   :  { %1022 = vmatpush3.msra.mxu0 %v66_v1 }
  0x2a   :  { %1023 = vmatprep.subr.mxu0 %v65_v3 }
  0x2b   :  { %1024 = vmatpush3.msra.mxu0 %v65_v3 }
  0x2c   :  { %1025 = vmatprep.subr.mxu0 %v64_v4 }
  0x2d   :  { %1026 = vmatpush3.msra.mxu0 %v64_v4 }
  0x2e   :  { %1028 = vmatmul.mubr.msk.f32.vlgmr.msra.gmra.mxu0 %vm75_vm0, %v63_v5 }
  0xee   :  { %v1029_v7 = vpop.f32.mrf.mxu0 }
  0xef   :  { %v154_v8 = vadd.f32 %v1029_v7, %v972_v6 }
  0xf0   :  { %v148_v9 = vpop.f32.mrf.mxu0 }
  0xf1   :  { %159 = vst.msk [vmem:[#allocation2 + $0x8] sm:$0xff] %vm157_vm1, %v154_v8  ;;  %v149_v10 = vadd.f32 %v972_v6, %v148_v9 }
  0xf3   :  { %158 = vst.msk [vmem:[#allocation2] sm:$0xff] %vm157_vm1, %v149_v10 }
  0xf4 LB: > { %v1226_v11 = vmov 0.0   ;;  %vm1227_vm2 = vmmov 0   ;;  %s975_s2 = sshll.u32 %s1219_s9, 3  ;;  %s1228_s11 = smov 96   ;;  %vm172_vm3 = vcmask 64512   ;;  %vm505_vm4 = vcmask 130112   ;;  %s1219_s9 = sphi %s1296_s9, %s165_s9  }
  0xf5   : > { %1030 = vmatprep.subr.mxu0 %v1226_v11  ;;  %1032 = vmatprep.mubr.msk.f32.mxu0 %vm1227_vm2, %v1226_v11  ;;  %s167_s10 = scalar_lea.vmem [#allocation2], %s975_s2  ;;  %s1229_s12 = smov 64   ;;  %vm676_vm5 = vcmask 195712   ;;  %vm847_vm6 = vcmask 261312  }
  0xf6   : > { %1035 = vmatprep.subr.mxu1 %v1226_v11  ;;  %1037 = vmatprep.mubr.msk.f32.mxu1 %vm1227_vm2, %v1226_v11  ;;  %s1230_s13 = smov 88   ;;  %s1231_s14 = smov 120  }
  0xf7   : > { %s1232_s15 = smov 80   ;;  %s1233_s16 = smov 112  }
  0xf8   : > { %s1234_s17 = smov 72   ;;  %s1235_s18 = smov 104  }
  0xf9   : > { %s1236_s19 = smov 56   ;;  %s1237_s20 = smov 48  }
  0xfa   : > { %v1310_v12 = vld [vmem:[%s167_s10] sm:$0xff]  ;;  %s1238_s21 = smov 40   ;;  %s1368_s22 = scalar_lea.vmem [#allocation3], %s975_s2 }
  0xfb   : > { %170 = vrot.lane.b32.xlu0 %v1310_v12, %s1228_s11  ;;  %257 = vrot.lane.b32.xlu1 %v1310_v12, %s1229_s12  ;;  %s1239_s25 = smov 8   ;;  %s1240_s26 = smov 16  }
  0xfc   : > { %s1241_s27 = smov 24   ;;  %s165_s9 = sadd.s32 1, %s1219_s9  }
  0xfd   : > { %p162_p1 = scmp.ge.s32.totalorder %s165_s9, 2  }
  0xfe   :  { %s1242_s30 = smov (%p162_p1), [#allocation10]  }
  0xff   : > { %338 = vrot.lane.b32.xlu1 %v1310_v12, %s1230_s13  ;;  %s950_s6 = sshll.u32 (%p162_p1), %s1242_s30, 4  ;;  %s951_s6 = int_to_ptr.vmem [resolvable:$true] %s950_s6 }
 0x100   :  { %s1187_s7 = scalar_lea.vmem (%p162_p1), %s951_s6, 256  ;;  %p1192_p3 = scmp.lt.s32.totalorder (%p162_p1), %s951_s6, %s951_s6 }
 0x101   :  { %p1188_p2 = scmp.ne.s32.totalorder (%p162_p1), %s951_s6, %s1187_s7  ;;  %p1193_p4 = scmp.lt.s32.totalorder (%p162_p1), %s1187_s7, %s1187_s7 }
 0x103   : > { %336 = vrot.lane.b32.xlu1 %v1310_v12, %s1231_s14  ;;  %p1194_p5 = por (%p162_p1), %p1193_p4, %p1192_p3 }
 0x105   :  { %p1195_p6 = pnand (%p162_p1), %p1194_p5, %p1188_p2 }
 0x107   : > { %509 = vrot.lane.b32.xlu1 %v1310_v12, %s1232_s15 }
 0x10b   : > { %507 = vrot.lane.b32.xlu1 %v1310_v12, %s1233_s16 }
 0x10f   : > { %680 = vrot.lane.b32.xlu1 %v1310_v12, %s1234_s17 }
 0x113   : > { %678 = vrot.lane.b32.xlu1 %v1310_v12, %s1235_s18 }
 0x16d   : > { %v171_v13 = vpop.permute.xlu0 %170  ;;  %v258_v17 = vpop.permute.xlu1 %257 }
 0x16e   : > { %1031 = vmatpush3.xpose.msk.msra.mxu0 %vm172_vm3, %v171_v13  ;;  %1036 = vmatpush3.msra.mxu1 %v258_v17 }
 0x16f   : > { %1045 = vmatprep.subr.mxu0 %v1226_v11  ;;  %1040 = vmatprep.subr.mxu1 %v1226_v11 }
 0x171   : > { %1033 = vmatmul.mubr.msk.f32.vlgmr.msra.gmra.mxu0 %vm172_vm3, %v1310_v12  ;;  %v339_v18 = vpop.permute.xlu1 %338 }
 0x172   : > { %1047 = vmatprep.mubr.msk.f32.mxu0 %vm1227_vm2, %v1226_v11 }
 0x175   : > { %v337_v22 = vpop.permute.xlu1 %336 }
 0x179   : > { %v510_v23 = vpop.permute.xlu1 %509 }
 0x17d   : > { %v508_v24 = vpop.permute.xlu1 %507 }
 0x181   : > { %v681_v26 = vpop.permute.xlu1 %680 }
 0x185   : > { %v679_v27 = vpop.permute.xlu1 %678 }
 0x231   : > { %v243_v14 = vpop.f32.mrf.mxu0 }
 0x232   : > { %v247_v15 = vsel %vm172_vm3, %v243_v14, -inf }
 0x233   : > { %248 = vmax.xlane.f32.xlu0 %v247_v15  ;;  %v1034_v16 = vpop.f32.mrf.mxu0  ;;  %v854_v15 = vld [vmem:[#allocation9 + $0x18] sm:$0xff] (%p162_p1) }
 0x234   :  { %v853_v16 = vld [vmem:[#allocation9 + $0x10] sm:$0xff] (%p162_p1) }
 0x249   : > { %424 = vrot.lane.b32.xlu0 %v1310_v12, %s1236_s19 }
 0x2bc   : > { %v249_v19 = vpop.xlane.xlu0 %248 }
 0x2bd   : > { %v250_v20 = vsub.f32 %v243_v14, %v249_v19  ;;  %v851_v19 = vld [vmem:[#allocation9] sm:$0xff] (%p162_p1) }
 0x2bf   : > { %v251_v21 = vmul.f32 1.442695, %v250_v20 }
 0x2c0   : > { %v425_v28 = vpop.permute.xlu0 %424 }
 0x2c1   : > { %1111 = vpow2.f32 %v251_v21  ;;  %1046 = vmatpush3.msra.mxu0 %v425_v28  ;;  %v988_v21 = vld [vmem:[%s1395_s4] ss:$0 sm:$0xff] (%p162_p1) }
 0x2c2   : > { %1055 = vmatprep.subr.mxu0 %v1226_v11 }
 0x2ce   : > { %v1329_v25 = vpop.eup %1111 }
 0x2cf   : > { %1038 = vmatmul.mubr.msk.f32.vlgmr.msra.gmra.mxu1 %vm172_vm3, %v1329_v25  ;;  %v253_v57 = vsel %vm172_vm3, %v1329_v25, 0.0 }
 0x2d0   : > { %1041 = vmatpush3.xpose.msk.msra.mxu1 %vm172_vm3, %v339_v18  ;;  %1042 = vmatprep.mubr.msk.f32.mxu1 %vm1227_vm2, %v1226_v11  ;;  %v852_v18 = vld [vmem:[#allocation9 + $0x8] sm:$0xff] (%p162_p1) }
 0x2d1   : > { %1050 = vmatprep.subr.mxu1 %v1226_v11 }
 0x2d3   : > { %1043 = vmatmul.mubr.msk.f32.vlgmr.msra.gmra.mxu1 %vm172_vm3, %v337_v22 }
 0x2d4   : > { %1051 = vmatpush3.xpose.msk.msra.mxu1 %vm172_vm3, %v510_v23  ;;  %1052 = vmatprep.mubr.msk.f32.mxu1 %vm1227_vm2, %v1226_v11 }
 0x2d5   : > { %1060 = vmatprep.subr.mxu1 %v1226_v11 }
 0x2d7   : > { %1053 = vmatmul.mubr.msk.f32.vlgmr.msra.gmra.mxu1 %vm172_vm3, %v508_v24 }
 0x2d8   : > { %1061 = vmatpush3.xpose.msk.msra.mxu1 %vm172_vm3, %v681_v26  ;;  %1062 = vmatprep.mubr.msk.f32.mxu1 %vm1227_vm2, %v1226_v11 }
 0x2db   : > { %1063 = vmatmul.mubr.msk.f32.vlgmr.msra.gmra.mxu1 %vm172_vm3, %v679_v27 }
 0x38f   : > { %v329_v29 = vpop.f32.mrf.mxu1 }
 0x391   : > { %v1039_v30 = vpop.f32.mrf.mxu1 }
 0x393   : > { %v410_v31 = vpop.f32.mrf.mxu1 }
 0x394   : > { %v414_v32 = vsel %vm172_vm3, %v410_v31, -inf }
 0x395   : > { %415 = vmax.xlane.f32.xlu1 %v414_v32  ;;  %v1044_v33 = vpop.f32.mrf.mxu1 }
 0x397   : > { %v581_v34 = vpop.f32.mrf.mxu1 }
 0x398   : > { %v585_v35 = vsel %vm172_vm3, %v581_v34, -inf }
 0x399   : > { %586 = vmax.xlane.f32.xlu0 %v585_v35  ;;  %v1054_v36 = vpop.f32.mrf.mxu1 }
 0x39b   : > { %v752_v37 = vpop.f32.mrf.mxu1 }
 0x39c   : > { %v756_v38 = vsel %vm172_vm3, %v752_v37, -inf }
 0x39d   : > { %757 = vmax.xlane.f32.xlu0 %v756_v38  ;;  %v1064_v39 = vpop.f32.mrf.mxu1 }
 0x3a6   : > { %595 = vrot.lane.b32.xlu1 %v1310_v12, %s1237_s20 }
 0x3b3   : > { %766 = vrot.lane.b32.xlu0 %v1310_v12, %s1238_s21 }
 0x41e   : > { %v416_v40 = vpop.xlane.xlu1 %415 }
 0x41f   : > { %v417_v41 = vsub.f32 %v410_v31, %v416_v40 }
 0x421   : > { %v418_v42 = vmul.f32 1.442695, %v417_v41 }
 0x422   : > { %v587_v43 = vpop.xlane.xlu0 %586  ;;  %v596_v49 = vpop.permute.xlu1 %595 }
 0x423   : > { %1113 = vpow2.f32 %v418_v42  ;;  %v588_v44 = vsub.f32 %v581_v34, %v587_v43 }
 0x425   : > { %v589_v45 = vmul.f32 1.442695, %v588_v44 }
 0x426   : > { %v758_v46 = vpop.xlane.xlu0 %757 }
 0x427   : > { %1115 = vpow2.f32 %v589_v45  ;;  %v759_v47 = vsub.f32 %v752_v37, %v758_v46 }
 0x429   : > { %v760_v48 = vmul.f32 1.442695, %v759_v47 }
 0x42a   : > { %v767_v52 = vpop.permute.xlu0 %766 }
 0x42b   : > { %1117 = vpow2.f32 %v760_v48 }
 0x430   : > { %v1114_v50 = vpop.eup %1113 }
 0x431   : > { %1048 = vmatmul.mubr.msk.f32.vlgmr.msra.gmra.mxu0 %vm172_vm3, %v1114_v50  ;;  %v420_v51 = vsel %vm172_vm3, %v1114_v50, 0.0 }
 0x432   : > { %1056 = vmatpush3.msra.mxu0 %v596_v49  ;;  %421 = vadd.xlane.f32.xlu0 %v420_v51 }
 0x433   : > { %1057 = vmatprep.mubr.msk.f32.mxu0 %vm1227_vm2, %v1226_v11  ;;  %1065 = vmatprep.subr.mxu0 %v1226_v11 }
 0x434   : > { %v1116_v53 = vpop.eup %1115 }
 0x435   : > { %1058 = vmatmul.mubr.msk.f32.vlgmr.msra.gmra.mxu0 %vm172_vm3, %v1116_v53  ;;  %v591_v54 = vsel %vm172_vm3, %v1116_v53, 0.0 }
 0x436   : > { %1066 = vmatpush3.msra.mxu0 %v767_v52  ;;  %592 = vadd.xlane.f32.xlu1 %v591_v54 }
 0x437   : > { %1067 = vmatprep.mubr.msk.f32.mxu0 %vm1227_vm2, %v1226_v11  ;;  %1070 = vmatprep.subr.mxu0 (%p162_p1), %v854_v15 }
 0x438   : > { %v1118_v55 = vpop.eup %1117 }
 0x439   : > { %1068 = vmatmul.mubr.msk.f32.vlgmr.msra.gmra.mxu0 %vm172_vm3, %v1118_v55  ;;  %v762_v56 = vsel %vm172_vm3, %v1118_v55, 0.0 }
 0x43a   : > { %763 = vadd.xlane.f32.xlu0 %v762_v56  ;;  %1071 = vmatpush3.msra.mxu0 (%p162_p1), %v854_v15 }
 0x43b   :  { %1072 = vmatprep.subr.mxu0 (%p162_p1), %v853_v16 }
 0x43c   :  { %1073 = vmatpush3.msra.mxu0 (%p162_p1), %v853_v16 }
 0x43d   :  { %1074 = vmatprep.subr.mxu0 (%p162_p1), %v852_v18 }
 0x43e   : > { %254 = vadd.xlane.f32.xlu0 %v253_v57  ;;  %1075 = vmatpush3.msra.mxu0 (%p162_p1), %v852_v18 }
 0x43f   :  { %1076 = vmatprep.subr.mxu0 (%p162_p1), %v851_v19 }
 0x440   :  { %1077 = vmatpush3.msra.mxu0 (%p162_p1), %v851_v19 }
 0x4bb   : > { %v422_v58 = vpop.xlane.xlu0 %421 }
 0x4bf   : > { %v593_v63 = vpop.xlane.xlu1 %592 }
 0x4c3   : > { %v764_v59 = vpop.xlane.xlu0 %763 }
 0x4c7   : > { %v255_v60 = vpop.xlane.xlu0 %254 }
 0x4c8   : > { %1119 = vrcp.f32 %v255_v60 }
 0x4c9   : > { %1121 = vrcp.f32 %v422_v58 }
 0x4ca   : > { %1123 = vrcp.f32 %v593_v63 }
 0x4cb   : > { %1125 = vrcp.f32 %v764_v59 }
 0x4d5   : > { %v1120_v61 = vpop.eup %1119 }
 0x4d6   : > { %v333_v62 = vmul.f32 %v1120_v61, %v329_v29  ;;  %v1122_v0 = vpop.eup %1121 }
 0x4d7   : > { %v1124_v4 = vpop.eup %1123 }
 0x4d8   : > { %335 = vst.msk [vmem:[%s1368_s22] sm:$0xff] %vm172_vm3, %v333_v62  ;;  %v1126_v8 = vpop.eup %1125 }
 0x4f1   : > { %v496_v1 = vpop.f32.mrf.mxu0 }
 0x4f2   : > { %v500_v2 = vmul.f32 %v1122_v0, %v496_v1 }
 0x4f3   : > { %v1049_v3 = vpop.f32.mrf.mxu0 }
 0x4f4   : > { %502 = vrot.lane.b32.xlu0 %v500_v2, %s1239_s25 }
 0x4f5   : > { %v667_v5 = vpop.f32.mrf.mxu0 }
 0x4f6   : > { %v671_v6 = vmul.f32 %v1124_v4, %v667_v5 }
 0x4f7   : > { %v1059_v7 = vpop.f32.mrf.mxu0 }
 0x4f8   : > { %673 = vrot.lane.b32.xlu1 %v671_v6, %s1240_s26 }
 0x4f9   : > { %v838_v9 = vpop.f32.mrf.mxu0 }
 0x4fa   : > { %v842_v10 = vmul.f32 %v1126_v8, %v838_v9 }
 0x4fb   : > { %v1069_v11 = vpop.f32.mrf.mxu0 }
 0x4fc   : > { %844 = vrot.lane.b32.xlu0 %v842_v10, %s1241_s27 }
 0x566   : > { %v503_v12 = vpop.permute.xlu0 %502 }
 0x567   : > { %506 = vst.msk [vmem:[%s1368_s22] sm:$0xff] %vm505_vm4, %v503_v12 }
 0x56a   : > { %v674_v13 = vpop.permute.xlu1 %673 }
 0x56b   : > { %677 = vst.msk [vmem:[%s1368_s22] sm:$0xff] %vm676_vm5, %v674_v13  ;;  %164 = sbr.rel (!%p162_p1) target bundleno = 244 (0xf4), region = 61 }
 0x56e   : > { %v845_v14 = vpop.permute.xlu0 %844 }
 0x56f   : > { %848 = vst.msk [vmem:[%s1368_s22] sm:$0xff] %vm847_vm6, %v845_v14 }
 0x576   :  { %v849_v17 = vld [vmem:[#allocation3] sm:$0xff]  ;;  %v850_v20 = vld [vmem:[#allocation3 + $0x8] sm:$0xff] }
 0x577   :  { %1078 = vmatprep.mubr.msk.f32.mxu0 %vm75_vm0, %v849_v17 }
 0x578   :  { %1079 = vmatmul.mubr.msk.f32.vlgmr.msra.gmra.mxu0 %vm75_vm0, %v850_v20 }
 0x638   :  { %v1080_v22 = vpop.f32.mrf.mxu0 }
 0x639   :  { %v940_v23 = vadd.f32 %v1080_v22, %v988_v21 }
 0x63a   :  { %v934_v24 = vpop.f32.mrf.mxu0 }
 0x63b   :  { %944 = vst.msk [vmem:[#allocation10 + $0x8] sm:$0xff] %vm75_vm0, %v940_v23  ;;  %v935_v25 = vadd.f32 %v988_v21, %v934_v24 }
 0x63d   :  { %943 = vst.msk [vmem:[#allocation10] sm:$0xff] %vm75_vm0, %v935_v25 }
 0x63e   :  { %1198 = shalt.err (!%p1195_p6)
}
 0x63f   :  { %956 = dma.vmem_to_hbm [thread:$0]  %s951_s6, 256, %s1396_s5, [#allocation6], %s1223_s23, %s1223_s23, %s1224_s24  }
 0x640   :  { %1215 = dma.done.wait [#allocation6], 256  }
 0x641   :  { %1216 = vsyncadd [#allocation6], 4294967040 }
 0x642   :  { %960 = vsyncpa [#allocation5], 1 }
 0x643   :  { %961 = vsyncpa [#allocation8], 1 }
 0x644   :  { %962 = vsyncpa [#allocation6], 1 }

// kernel: tpu_custom_call.1
= control target key start
LH: loop header
LB: loop body
LE: loop exit
PB: predicated region body
PF: predicated region fallthrough
CT: control target
= control target key end

     0   :  { %10 = vsyncpa [#allocation5], 0  ;;  %s1391_s0 = inlined_call_operand.hbm [shape: f32[2,8,32], index: 0, kind: input, shape index: {}]   ;;  %s1392_s1 = inlined_call_operand.hbm [shape: f32[32,96], index: 1, kind: input, shape index: {}]   ;;  %s1393_s2 = inlined_call_operand.vmem [shape: f32[1,96], index: 2, kind: input, shape index: {}]   ;;  %s1394_s3 = inlined_call_operand.hbm [shape: f32[32,32], index: 3, kind: input, shape index: {}]   ;;  %s1395_s4 = inlined_call_operand.vmem [shape: f32[1,32], index: 4, kind: input, shape index: {}]   ;;  %s1396_s5 = inlined_call_operand.hbm [shape: f32[2,8,32], index: 5, kind: output, shape index: {}]  }
   0x1   :  { %11 = vsyncpa [#allocation8], 0 }
   0x2   :  { %12 = vsyncpa [#allocation6], 0  ;;  %s1221_s18 = smov [#allocation7]   ;;  %s1222_s20 = smov [#allocation4]  }
   0x3   :  { %s30_s19 = sshll.u32 %s1221_s18, 4  ;;  %s18_s21 = sshll.u32 %s1222_s20, 4  ;;  %s31_s19 = int_to_ptr.vmem [resolvable:$true] %s30_s19  ;;  %s19_s21 = int_to_ptr.vmem [resolvable:$true] %s18_s21 }
   0x4   :  { %s1135_s22 = scalar_lea.vmem %s31_s19, 512  ;;  %p1140_p1 = scmp.lt.s32.totalorder %s31_s19, %s31_s19 }
   0x5   :  { %p1136_p0 = scmp.ne.s32.totalorder %s31_s19, %s1135_s22  ;;  %p1141_p2 = scmp.lt.s32.totalorder %s1135_s22, %s1135_s22 }
   0x7   :  { %p1142_p3 = por %p1141_p2, %p1140_p1 }
   0x9   :  { %p1143_p4 = pnand %p1142_p3, %p1136_p0 }
   0xb   :  { %1146 = shalt.err (!%p1143_p4)
}
   0xc   :  { %s1223_s23 = smov 128   ;;  %s1224_s24 = smov 8  }
   0xd   :  { %36 = dma.hbm_to_vmem [thread:$0]  %s1392_s1, 512, %s31_s19, [#allocation8], %s1223_s23, %s1223_s23, %s1224_s24  }
   0xe   :  { %s1155_s27 = scalar_lea.vmem %s19_s21, 256  ;;  %p1160_p6 = scmp.lt.s32.totalorder %s19_s21, %s19_s21 }
   0xf   :  { %p1156_p5 = scmp.ne.s32.totalorder %s19_s21, %s1155_s27  ;;  %p1161_p7 = scmp.lt.s32.totalorder %s1155_s27, %s1155_s27 }
  0x11   :  { %p1162_p8 = por %p1161_p7, %p1160_p6 }
  0x13   :  { %p1163_p9 = pnand %p1162_p8, %p1156_p5 }
  0x15   :  { %1166 = shalt.err (!%p1163_p9)
}
  0x16   :  { %24 = dma.hbm_to_vmem [thread:$0]  %s1391_s0, 256, %s19_s21, [#allocation5], %s1223_s23, %s1223_s23, %s1224_s24  }
  0x17   :  { %s1225_s30 = smov [#allocation9]  }
  0x18   :  { %s44_s6 = sshll.u32 %s1225_s30, 4  ;;  %s45_s6 = int_to_ptr.vmem [resolvable:$true] %s44_s6 }
  0x19   :  { %s1175_s7 = scalar_lea.vmem %s45_s6, 512  ;;  %p1180_p11 = scmp.lt.s32.totalorder %s45_s6, %s45_s6 }
  0x1a   :  { %p1176_p10 = scmp.ne.s32.totalorder %s45_s6, %s1175_s7  ;;  %p1181_p12 = scmp.lt.s32.totalorder %s1175_s7, %s1175_s7 }
  0x1c   :  { %p1182_p13 = por %p1181_p12, %p1180_p11 }
  0x1e   :  { %p1183_p0 = pnand %p1182_p13, %p1176_p10 }
  0x20   :  { %1186 = shalt.err (!%p1183_p0)
}
  0x21   :  { %50 = dma.hbm_to_vmem [thread:$0]  %s1394_s3, 512, %s45_s6, [#allocation8], %s1223_s23, %s1223_s23, %s1224_s24  }
  0x22   :  { %1211 = dma.done.wait [#allocation5], 256  }
  0x23   :  { %1212 = vsyncadd [#allocation5], 4294967040 }
  0x24   :  { %1213 = dma.done.wait [#allocation8], 1024  }
  0x25   :  { %1214 = vsyncadd [#allocation8], 4294966272  ;;  %vm75_vm0 = vcmask 261120   ;;  %v67_v0 = vld [vmem:[#allocation7 + $0x18] sm:$0xff]  ;;  %v66_v1 = vld [vmem:[#allocation7 + $0x10] sm:$0xff]  ;;  %vm157_vm1 = vcmask 785408  }
  0x26   :  { %1019 = vmatprep.subr.mxu0 %v67_v0  ;;  %v62_v2 = vld [vmem:[#allocation4] sm:$0xff]  ;;  %v65_v3 = vld [vmem:[#allocation7 + $0x8] sm:$0xff]  ;;  %v64_v4 = vld [vmem:[#allocation7] sm:$0xff]  ;;  %s1296_s9 = smov 0  }
  0x27   :  { %1020 = vmatpush3.msra.mxu0 %v67_v0  ;;  %1027 = vmatprep.mubr.msk.f32.mxu0 %vm75_vm0, %v62_v2  ;;  %v63_v5 = vld [vmem:[#allocation4 + $0x8] sm:$0xff]  ;;  %v972_v6 = vld [vmem:[%s1393_s2] ss:$0 sm:$0xff] }
  0x28   :  { %1021 = vmatprep.subr.mxu0 %v66_v1 }
  0x29   :  { %1022 = vmatpush3.msra.mxu0 %v66_v1 }
  0x2a   :  { %1023 = vmatprep.subr.mxu0 %v65_v3 }
  0x2b   :  { %1024 = vmatpush3.msra.mxu0 %v65_v3 }
  0x2c   :  { %1025 = vmatprep.subr.mxu0 %v64_v4 }
  0x2d   :  { %1026 = vmatpush3.msra.mxu0 %v64_v4 }
  0x2e   :  { %1028 = vmatmul.mubr.msk.f32.vlgmr.msra.gmra.mxu0 %vm75_vm0, %v63_v5 }
  0xee   :  { %v1029_v7 = vpop.f32.mrf.mxu0 }
  0xef   :  { %v154_v8 = vadd.f32 %v1029_v7, %v972_v6 }
  0xf0   :  { %v148_v9 = vpop.f32.mrf.mxu0 }
  0xf1   :  { %159 = vst.msk [vmem:[#allocation2 + $0x8] sm:$0xff] %vm157_vm1, %v154_v8  ;;  %v149_v10 = vadd.f32 %v972_v6, %v148_v9 }
  0xf3   :  { %158 = vst.msk [vmem:[#allocation2] sm:$0xff] %vm157_vm1, %v149_v10 }
  0xf4 LB: > { %v1226_v11 = vmov 0.0   ;;  %vm1227_vm2 = vmmov 0   ;;  %s975_s2 = sshll.u32 %s1219_s9, 3  ;;  %s1228_s11 = smov 96   ;;  %vm172_vm3 = vcmask 64512   ;;  %vm505_vm4 = vcmask 130112   ;;  %s1219_s9 = sphi %s1296_s9, %s165_s9  }
  0xf5   : > { %1030 = vmatprep.subr.mxu0 %v1226_v11  ;;  %1032 = vmatprep.mubr.msk.f32.mxu0 %vm1227_vm2, %v1226_v11  ;;  %s167_s10 = scalar_lea.vmem [#allocation2], %s975_s2  ;;  %s1229_s12 = smov 64   ;;  %vm676_vm5 = vcmask 195712   ;;  %vm847_vm6 = vcmask 261312  }
  0xf6   : > { %1035 = vmatprep.subr.mxu1 %v1226_v11  ;;  %1037 = vmatprep.mubr.msk.f32.mxu1 %vm1227_vm2, %v1226_v11  ;;  %s1230_s13 = smov 88   ;;  %s1231_s14 = smov 120  }
  0xf7   : > { %s1232_s15 = smov 80   ;;  %s1233_s16 = smov 112  }
  0xf8   : > { %s1234_s17 = smov 72   ;;  %s1235_s18 = smov 104  }
  0xf9   : > { %s1236_s19 = smov 56   ;;  %s1237_s20 = smov 48  }
  0xfa   : > { %v1310_v12 = vld [vmem:[%s167_s10] sm:$0xff]  ;;  %s1238_s21 = smov 40   ;;  %s1368_s22 = scalar_lea.vmem [#allocation3], %s975_s2 }
  0xfb   : > { %170 = vrot.lane.b32.xlu0 %v1310_v12, %s1228_s11  ;;  %257 = vrot.lane.b32.xlu1 %v1310_v12, %s1229_s12  ;;  %s1239_s25 = smov 8   ;;  %s1240_s26 = smov 16  }
  0xfc   : > { %s1241_s27 = smov 24   ;;  %s165_s9 = sadd.s32 1, %s1219_s9  }
  0xfd   : > { %p162_p1 = scmp.ge.s32.totalorder %s165_s9, 2  }
  0xfe   :  { %s1242_s30 = smov (%p162_p1), [#allocation10]  }
  0xff   : > { %338 = vrot.lane.b32.xlu1 %v1310_v12, %s1230_s13  ;;  %s950_s6 = sshll.u32 (%p162_p1), %s1242_s30, 4  ;;  %s951_s6 = int_to_ptr.vmem [resolvable:$true] %s950_s6 }
 0x100   :  { %s1187_s7 = scalar_lea.vmem (%p162_p1), %s951_s6, 256  ;;  %p1192_p3 = scmp.lt.s32.totalorder (%p162_p1), %s951_s6, %s951_s6 }
 0x101   :  { %p1188_p2 = scmp.ne.s32.totalorder (%p162_p1), %s951_s6, %s1187_s7  ;;  %p1193_p4 = scmp.lt.s32.totalorder (%p162_p1), %s1187_s7, %s1187_s7 }
 0x103   : > { %336 = vrot.lane.b32.xlu1 %v1310_v12, %s1231_s14  ;;  %p1194_p5 = por (%p162_p1), %p1193_p4, %p1192_p3 }
 0x105   :  { %p1195_p6 = pnand (%p162_p1), %p1194_p5, %p1188_p2 }
 0x107   : > { %509 = vrot.lane.b32.xlu1 %v1310_v12, %s1232_s15 }
 0x10b   : > { %507 = vrot.lane.b32.xlu1 %v1310_v12, %s1233_s16 }
 0x10f   : > { %680 = vrot.lane.b32.xlu1 %v1310_v12, %s1234_s17 }
 0x113   : > { %678 = vrot.lane.b32.xlu1 %v1310_v12, %s1235_s18 }
 0x16d   : > { %v171_v13 = vpop.permute.xlu0 %170  ;;  %v258_v17 = vpop.permute.xlu1 %257 }
 0x16e   : > { %1031 = vmatpush3.xpose.msk.msra.mxu0 %vm172_vm3, %v171_v13  ;;  %1036 = vmatpush3.msra.mxu1 %v258_v17 }
 0x16f   : > { %1045 = vmatprep.subr.mxu0 %v1226_v11  ;;  %1040 = vmatprep.subr.mxu1 %v1226_v11 }
 0x171   : > { %1033 = vmatmul.mubr.msk.f32.vlgmr.msra.gmra.mxu0 %vm172_vm3, %v1310_v12  ;;  %v339_v18 = vpop.permute.xlu1 %338 }
 0x172   : > { %1047 = vmatprep.mubr.msk.f32.mxu0 %vm1227_vm2, %v1226_v11 }
 0x175   : > { %v337_v22 = vpop.permute.xlu1 %336 }
 0x179   : > { %v510_v23 = vpop.permute.xlu1 %509 }
 0x17d   : > { %v508_v24 = vpop.permute.xlu1 %507 }
 0x181   : > { %v681_v26 = vpop.permute.xlu1 %680 }
 0x185   : > { %v679_v27 = vpop.permute.xlu1 %678 }
 0x231   : > { %v243_v14 = vpop.f32.mrf.mxu0 }
 0x232   : > { %v247_v15 = vsel %vm172_vm3, %v243_v14, -inf }
 0x233   : > { %248 = vmax.xlane.f32.xlu0 %v247_v15  ;;  %v1034_v16 = vpop.f32.mrf.mxu0  ;;  %v854_v15 = vld [vmem:[#allocation9 + $0x18] sm:$0xff] (%p162_p1) }
 0x234   :  { %v853_v16 = vld [vmem:[#allocation9 + $0x10] sm:$0xff] (%p162_p1) }
 0x249   : > { %424 = vrot.lane.b32.xlu0 %v1310_v12, %s1236_s19 }
 0x2bc   : > { %v249_v19 = vpop.xlane.xlu0 %248 }
 0x2bd   : > { %v250_v20 = vsub.f32 %v243_v14, %v249_v19  ;;  %v851_v19 = vld [vmem:[#allocation9] sm:$0xff] (%p162_p1) }
 0x2bf   : > { %v251_v21 = vmul.f32 1.442695, %v250_v20 }
 0x2c0   : > { %v425_v28 = vpop.permute.xlu0 %424 }
 0x2c1   : > { %1111 = vpow2.f32 %v251_v21  ;;  %1046 = vmatpush3.msra.mxu0 %v425_v28  ;;  %v988_v21 = vld [vmem:[%s1395_s4] ss:$0 sm:$0xff] (%p162_p1) }
 0x2c2   : > { %1055 = vmatprep.subr.mxu0 %v1226_v11 }
 0x2ce   : > { %v1329_v25 = vpop.eup %1111 }
 0x2cf   : > { %1038 = vmatmul.mubr.msk.f32.vlgmr.msra.gmra.mxu1 %vm172_vm3, %v1329_v25  ;;  %v253_v57 = vsel %vm172_vm3, %v1329_v25, 0.0 }
 0x2d0   : > { %1041 = vmatpush3.xpose.msk.msra.mxu1 %vm172_vm3, %v339_v18  ;;  %1042 = vmatprep.mubr.msk.f32.mxu1 %vm1227_vm2, %v1226_v11  ;;  %v852_v18 = vld [vmem:[#allocation9 + $0x8] sm:$0xff] (%p162_p1) }
 0x2d1   : > { %1050 = vmatprep.subr.mxu1 %v1226_v11 }
 0x2d3   : > { %1043 = vmatmul.mubr.msk.f32.vlgmr.msra.gmra.mxu1 %vm172_vm3, %v337_v22 }
 0x2d4   : > { %1051 = vmatpush3.xpose.msk.msra.mxu1 %vm172_vm3, %v510_v23  ;;  %1052 = vmatprep.mubr.msk.f32.mxu1 %vm1227_vm2, %v1226_v11 }
 0x2d5   : > { %1060 = vmatprep.subr.mxu1 %v1226_v11 }
 0x2d7   : > { %1053 = vmatmul.mubr.msk.f32.vlgmr.msra.gmra.mxu1 %vm172_vm3, %v508_v24 }
 0x2d8   : > { %1061 = vmatpush3.xpose.msk.msra.mxu1 %vm172_vm3, %v681_v26  ;;  %1062 = vmatprep.mubr.msk.f32.mxu1 %vm1227_vm2, %v1226_v11 }
 0x2db   : > { %1063 = vmatmul.mubr.msk.f32.vlgmr.msra.gmra.mxu1 %vm172_vm3, %v679_v27 }
 0x38f   : > { %v329_v29 = vpop.f32.mrf.mxu1 }
 0x391   : > { %v1039_v30 = vpop.f32.mrf.mxu1 }
 0x393   : > { %v410_v31 = vpop.f32.mrf.mxu1 }
 0x394   : > { %v414_v32 = vsel %vm172_vm3, %v410_v31, -inf }
 0x395   : > { %415 = vmax.xlane.f32.xlu1 %v414_v32  ;;  %v1044_v33 = vpop.f32.mrf.mxu1 }
 0x397   : > { %v581_v34 = vpop.f32.mrf.mxu1 }
 0x398   : > { %v585_v35 = vsel %vm172_vm3, %v581_v34, -inf }
 0x399   : > { %586 = vmax.xlane.f32.xlu0 %v585_v35  ;;  %v1054_v36 = vpop.f32.mrf.mxu1 }
 0x39b   : > { %v752_v37 = vpop.f32.mrf.mxu1 }
 0x39c   : > { %v756_v38 = vsel %vm172_vm3, %v752_v37, -inf }
 0x39d   : > { %757 = vmax.xlane.f32.xlu0 %v756_v38  ;;  %v1064_v39 = vpop.f32.mrf.mxu1 }
 0x3a6   : > { %595 = vrot.lane.b32.xlu1 %v1310_v12, %s1237_s20 }
 0x3b3   : > { %766 = vrot.lane.b32.xlu0 %v1310_v12, %s1238_s21 }
 0x41e   : > { %v416_v40 = vpop.xlane.xlu1 %415 }
 0x41f   : > { %v417_v41 = vsub.f32 %v410_v31, %v416_v40 }
 0x421   : > { %v418_v42 = vmul.f32 1.442695, %v417_v41 }
 0x422   : > { %v587_v43 = vpop.xlane.xlu0 %586  ;;  %v596_v49 = vpop.permute.xlu1 %595 }
 0x423   : > { %1113 = vpow2.f32 %v418_v42  ;;  %v588_v44 = vsub.f32 %v581_v34, %v587_v43 }
 0x425   : > { %v589_v45 = vmul.f32 1.442695, %v588_v44 }
 0x426   : > { %v758_v46 = vpop.xlane.xlu0 %757 }
 0x427   : > { %1115 = vpow2.f32 %v589_v45  ;;  %v759_v47 = vsub.f32 %v752_v37, %v758_v46 }
 0x429   : > { %v760_v48 = vmul.f32 1.442695, %v759_v47 }
 0x42a   : > { %v767_v52 = vpop.permute.xlu0 %766 }
 0x42b   : > { %1117 = vpow2.f32 %v760_v48 }
 0x430   : > { %v1114_v50 = vpop.eup %1113 }
 0x431   : > { %1048 = vmatmul.mubr.msk.f32.vlgmr.msra.gmra.mxu0 %vm172_vm3, %v1114_v50  ;;  %v420_v51 = vsel %vm172_vm3, %v1114_v50, 0.0 }
 0x432   : > { %1056 = vmatpush3.msra.mxu0 %v596_v49  ;;  %421 = vadd.xlane.f32.xlu0 %v420_v51 }
 0x433   : > { %1057 = vmatprep.mubr.msk.f32.mxu0 %vm1227_vm2, %v1226_v11  ;;  %1065 = vmatprep.subr.mxu0 %v1226_v11 }
 0x434   : > { %v1116_v53 = vpop.eup %1115 }
 0x435   : > { %1058 = vmatmul.mubr.msk.f32.vlgmr.msra.gmra.mxu0 %vm172_vm3, %v1116_v53  ;;  %v591_v54 = vsel %vm172_vm3, %v1116_v53, 0.0 }
 0x436   : > { %1066 = vmatpush3.msra.mxu0 %v767_v52  ;;  %592 = vadd.xlane.f32.xlu1 %v591_v54 }
 0x437   : > { %1067 = vmatprep.mubr.msk.f32.mxu0 %vm1227_vm2, %v1226_v11  ;;  %1070 = vmatprep.subr.mxu0 (%p162_p1), %v854_v15 }
 0x438   : > { %v1118_v55 = vpop.eup %1117 }
 0x439   : > { %1068 = vmatmul.mubr.msk.f32.vlgmr.msra.gmra.mxu0 %vm172_vm3, %v1118_v55  ;;  %v762_v56 = vsel %vm172_vm3, %v1118_v55, 0.0 }
 0x43a   : > { %763 = vadd.xlane.f32.xlu0 %v762_v56  ;;  %1071 = vmatpush3.msra.mxu0 (%p162_p1), %v854_v15 }
 0x43b   :  { %1072 = vmatprep.subr.mxu0 (%p162_p1), %v853_v16 }
 0x43c   :  { %1073 = vmatpush3.msra.mxu0 (%p162_p1), %v853_v16 }
 0x43d   :  { %1074 = vmatprep.subr.mxu0 (%p162_p1), %v852_v18 }
 0x43e   : > { %254 = vadd.xlane.f32.xlu0 %v253_v57  ;;  %1075 = vmatpush3.msra.mxu0 (%p162_p1), %v852_v18 }
 0x43f   :  { %1076 = vmatprep.subr.mxu0 (%p162_p1), %v851_v19 }
 0x440   :  { %1077 = vmatpush3.msra.mxu0 (%p162_p1), %v851_v19 }
 0x4bb   : > { %v422_v58 = vpop.xlane.xlu0 %421 }
 0x4bf   : > { %v593_v63 = vpop.xlane.xlu1 %592 }
 0x4c3   : > { %v764_v59 = vpop.xlane.xlu0 %763 }
 0x4c7   : > { %v255_v60 = vpop.xlane.xlu0 %254 }
 0x4c8   : > { %1119 = vrcp.f32 %v255_v60 }
 0x4c9   : > { %1121 = vrcp.f32 %v422_v58 }
 0x4ca   : > { %1123 = vrcp.f32 %v593_v63 }
 0x4cb   : > { %1125 = vrcp.f32 %v764_v59 }
 0x4d5   : > { %v1120_v61 = vpop.eup %1119 }
 0x4d6   : > { %v333_v62 = vmul.f32 %v1120_v61, %v329_v29  ;;  %v1122_v0 = vpop.eup %1121 }
 0x4d7   : > { %v1124_v4 = vpop.eup %1123 }
 0x4d8   : > { %335 = vst.msk [vmem:[%s1368_s22] sm:$0xff] %vm172_vm3, %v333_v62  ;;  %v1126_v8 = vpop.eup %1125 }
 0x4f1   : > { %v496_v1 = vpop.f32.mrf.mxu0 }
 0x4f2   : > { %v500_v2 = vmul.f32 %v1122_v0, %v496_v1 }
 0x4f3   : > { %v1049_v3 = vpop.f32.mrf.mxu0 }
 0x4f4   : > { %502 = vrot.lane.b32.xlu0 %v500_v2, %s1239_s25 }
 0x4f5   : > { %v667_v5 = vpop.f32.mrf.mxu0 }
 0x4f6   : > { %v671_v6 = vmul.f32 %v1124_v4, %v667_v5 }
 0x4f7   : > { %v1059_v7 = vpop.f32.mrf.mxu0 }
 0x4f8   : > { %673 = vrot.lane.b32.xlu1 %v671_v6, %s1240_s26 }
 0x4f9   : > { %v838_v9 = vpop.f32.mrf.mxu0 }
 0x4fa   : > { %v842_v10 = vmul.f32 %v1126_v8, %v838_v9 }
 0x4fb   : > { %v1069_v11 = vpop.f32.mrf.mxu0 }
 0x4fc   : > { %844 = vrot.lane.b32.xlu0 %v842_v10, %s1241_s27 }
 0x566   : > { %v503_v12 = vpop.permute.xlu0 %502 }
 0x567   : > { %506 = vst.msk [vmem:[%s1368_s22] sm:$0xff] %vm505_vm4, %v503_v12 }
 0x56a   : > { %v674_v13 = vpop.permute.xlu1 %673 }
 0x56b   : > { %677 = vst.msk [vmem:[%s1368_s22] sm:$0xff] %vm676_vm5, %v674_v13  ;;  %164 = sbr.rel (!%p162_p1) target bundleno = 244 (0xf4), region = 61 }
 0x56e   : > { %v845_v14 = vpop.permute.xlu0 %844 }
 0x56f   : > { %848 = vst.msk [vmem:[%s1368_s22] sm:$0xff] %vm847_vm6, %v845_v14 }
 0x576   :  { %v849_v17 = vld [vmem:[#allocation3] sm:$0xff]  ;;  %v850_v20 = vld [vmem:[#allocation3 + $0x8] sm:$0xff] }
 0x577   :  { %1078 = vmatprep.mubr.msk.f32.mxu0 %vm75_vm0, %v849_v17 }
 0x578   :  { %1079 = vmatmul.mubr.msk.f32.vlgmr.msra.gmra.mxu0 %vm75_vm0, %v850_v20 }
 0x638   :  { %v1080_v22 = vpop.f32.mrf.mxu0 }
 0x639   :  { %v940_v23 = vadd.f32 %v1080_v22, %v988_v21 }
 0x63a   :  { %v934_v24 = vpop.f32.mrf.mxu0 }
 0x63b   :  { %944 = vst.msk [vmem:[#allocation10 + $0x8] sm:$0xff] %vm75_vm0, %v940_v23  ;;  %v935_v25 = vadd.f32 %v988_v21, %v934_v24 }
 0x63d   :  { %943 = vst.msk [vmem:[#allocation10] sm:$0xff] %vm75_vm0, %v935_v25 }
 0x63e   :  { %1198 = shalt.err (!%p1195_p6)
}
 0x63f   :  { %956 = dma.vmem_to_hbm [thread:$0]  %s951_s6, 256, %s1396_s5, [#allocation6], %s1223_s23, %s1223_s23, %s1224_s24  }
 0x640   :  { %1215 = dma.done.wait [#allocation6], 256  }
 0x641   :  { %1216 = vsyncadd [#allocation6], 4294967040 }
 0x642   :  { %960 = vsyncpa [#allocation5], 1 }
 0x643   :  { %961 = vsyncpa [#allocation8], 1 }
 0x644   :  { %962 = vsyncpa [#allocation6], 1 }

</bundles_post_ra>
